<compile_context>
chip_gen: v5e
topology: v5e:2x2
jax: 0.10.0
libtpu: 0.0.40
codegen_flags: <defaults>
</compile_context>

<pallas_src>
import functools

import jax
import jax.numpy as jnp
from jax.experimental import pallas as pl
from jax.experimental.pallas import tpu as pltpu

_SUB = 8      # f32 sublanes per vreg
_LANE = 128   # lanes per vreg


def _round_up(x, m):
    return ((x + m - 1) // m) * m


# -----------------------------------------------------------------------------
# Pallas kernel: (sublane x lane)-batched small least-squares solve
# -----------------------------------------------------------------------------
def _lstsq_kernel(a_ref, b_ref, o_ref, *, m_rows, kmax):
    """Solve (A^T A) x = A^T b for 8*TBL independent problems per grid step.

    a_ref: (m_rows*kmax, 8, TBL)  -- A rows flattened on the leading axis
    b_ref: (m_rows,      8, TBL)
    o_ref: (kmax,        8, TBL)
    Each slab a_ref[r] / b_ref[m] / o_ref[k] is a dense (8, TBL) f32 tile.
    """
    # ---- Gram matrix (upper triangle only; G is symmetric) and rhs,
    #      accumulated m-outer so the live set is K(K+1)/2 + K accumulator
    #      slabs plus K+1 freshly loaded row slabs.
    G = {}
    c = [None] * kmax
    for m in range(m_rows):
        rows = [a_ref[m * kmax + i] for i in range(kmax)]
        bm = b_ref[m]
        for i in range(kmax):
            for j in range(i, kmax):
                t = rows[i] * rows[j]
                G[(i, j)] = t if m == 0 else G[(i, j)] + t
            t = rows[i] * bm
            c[i] = t if m == 0 else c[i] + t
    # Mirror the lower triangle by aliasing (no copies; values never mutated).
    for i in range(kmax):
        for j in range(i + 1, kmax):
            G[(j, i)] = G[(i, j)]

    # ---- Gauss-Jordan elimination, fully unrolled on per-entry slabs.
    #      G = A^T A is SPD -> no pivoting; eps guards exact-zero pivots on
    #      degenerate windows.  (For heavily ill-conditioned windows a Jacobi
    #      pre-scaling of G could be added here; not needed at 1e-4 tol.)
    eps = jnp.float32(1e-12)
    for k in range(kmax):
        p = G[(k, k)] + eps
        r = pl.reciprocal(p, approx=True)      # EUP slot, free vs VALU
        r = r * (2.0 - p * r)                  # one Newton step -> ~f32 exact
        row_k = {j: G[(k, j)] * r for j in range(k + 1, kmax)}
        c_k = c[k] * r
        for j in range(k + 1, kmax):
            G[(k, j)] = row_k[j]
        c[k] = c_k
        for i in range(kmax):
            if i == k:
                continue
            f = G[(i, k)]
            for j in range(k + 1, kmax):
                G[(i, j)] = G[(i, j)] - f * row_k[j]
            c[i] = c[i] - f * c_k

    # Dense, unmasked (8, TBL) store per solution row.
    for i in range(kmax):
        o_ref[i] = c[i]


# -----------------------------------------------------------------------------
# Wrappers (lane-major interface: A (M, K, B), b (M, B), result (B, K))
# -----------------------------------------------------------------------------
def batched_lstsq_reference(A_lm, b_lm):
    """Pure-JAX reference / small-batch fallback."""
    A = jnp.transpose(A_lm, (2, 0, 1)).astype(jnp.float32)        # (B, M, K)
    b = jnp.transpose(b_lm, (1, 0)).astype(jnp.float32)[..., None]  # (B, M, 1)
    G = jnp.einsum('bmi,bmj->bij', A, A)
    cc = jnp.einsum('bmi,bmo->bio', A, b)
    return jnp.linalg.solve(G, cc)[..., 0]                         # (B, K)


def batched_lstsq_pallas(A_lm, b_lm, *, lane_tile=256,
                         vmem_budget_bytes=8 * 1024 * 1024):
    """Solve x = (A^T A)^{-1} A^T b for a batch of small problems on TPU.

    A_lm: (M, K, B) float32 lane-major, b_lm: (M, B) -> x: (B, K) float32.
    """
    M, K, B = A_lm.shape
    A_lm = A_lm.astype(jnp.float32)
    b_lm = b_lm.astype(jnp.float32)

    # Padded-aware block-byte accounting (every stream is (8, TBL)-dense),
    # double-buffered by the pipeline.  Defaults stay far below v7x's 32 MiB
    # scoped VMEM limit while amortising the ~0.35 us per-step overhead.
    def blk_bytes(tbl):
        return 2 * 4 * _SUB * tbl * (M * K + M + K)

    tbl = max(_LANE, (lane_tile // _LANE) * _LANE)
    while tbl > _LANE and blk_bytes(tbl) > vmem_budget_bytes:
        tbl -= _LANE
    TBL = tbl
    TB = _SUB * TBL                     # problems per grid step

    B_pad = _round_up(max(B, TB), TB)
    if B_pad != B:
        # Replicate the last problem into padded lanes (keeps them well
        # conditioned); padded results are sliced off below.
        A_lm = jnp.pad(A_lm, ((0, 0), (0, 0), (0, B_pad - B)), mode='edge')
        b_lm = jnp.pad(b_lm, ((0, 0), (0, B_pad - B)), mode='edge')

    BL = B_pad // _SUB
    # Layout-preserving reshapes only (no copy passes): rows flatten onto the
    # leading dim, the problem batch splits onto (sublane, lane).
    A3 = A_lm.reshape(M * K, _SUB, BL)
    b3 = b_lm.reshape(M, _SUB, BL)

    kernel = functools.partial(_lstsq_kernel, m_rows=M, kmax=K)
    x3 = pl.pallas_call(
        kernel,
        out_shape=jax.ShapeDtypeStruct((K, _SUB, BL), jnp.float32),
        grid=(BL // TBL,),
        in_specs=[
            # NOTE (v5e): if xprof still shows exposed DMA on the A stream,
            # add pipeline_mode=pl.Buffered(3) here and sweep 2 vs 3.
            pl.BlockSpec((M * K, _SUB, TBL), lambda i: (0, 0, i)),
            pl.BlockSpec((M, _SUB, TBL), lambda i: (0, 0, i)),
        ],
        out_specs=pl.BlockSpec((K, _SUB, TBL), lambda i: (0, 0, i)),
        compiler_params=pltpu.CompilerParams(
            dimension_semantics=("parallel",)),
    )(A3, b3)

    x = x3.reshape(K, B_pad)[:, :B]     # (K, B) lane-major
    return jnp.transpose(x, (1, 0))     # (B, K)


def batched_lstsq(A_lm, b_lm, *, min_pallas_batch=256):
    """Dispatch: Pallas for large batches, fused XLA solve for tiny ones."""
    if A_lm.shape[-1] < min_pallas_batch:
        return batched_lstsq_reference(A_lm, b_lm)
    return batched_lstsq_pallas(A_lm, b_lm)


# -----------------------------------------------------------------------------
# JAX port of the module (glue / parameter setup in plain JAX, built lane-major)
# -----------------------------------------------------------------------------
class KLInferenceSGD:
    def __init__(self, K_list, aggregates, lr, solve_mean, solve_std,
                 opt_normspace=True, kldirection='qp', covariance=False,
                 pallas_min_batch=256):
        self.K_list = K_list
        self.aggregates = aggregates
        self.lr = lr
        self.solve_mean = solve_mean
        self.solve_std = solve_std
        self.opt_normspace = opt_normspace
        self.kldirection = kldirection
        self.covariance = covariance
        self.pallas_min_batch = pallas_min_batch

    def _get_a(self, agg, K):
        if agg == 'sum':
            return jnp.ones((K,), jnp.float32) / float(K)
        if agg == 'slope':
            if K == 1:
                return jnp.ones((K,), jnp.float32)
            x = jnp.arange(K, dtype=jnp.float32)
            m_x = x.mean()
            s_xx = ((x - m_x) ** 2).sum()
            return (x - m_x) / s_xx
        if agg == 'haar':
            a_ = jnp.ones((K,), jnp.float32) / float(K)
            s = K // 2
            return jnp.concatenate([a_[:s] * -1.0, a_[s:]], axis=0)
        raise ValueError(agg)

    # --- get_A equivalent, built lane-major: (nb, Nwin, bs) ------------------
    def _get_A_lm(self, agg, K, Nwin, sigma):
        # sigma: (bs, nb, 1)
        a = self._get_a(agg, K)
        nb = Nwin // K
        blocks = jnp.zeros((nb, Nwin), jnp.float32)
        for j in range(nb):
            blocks = blocks.at[j, j * K:(j + 1) * K].set(a)
        inv_sig = jnp.transpose((1.0 / sigma)[:, :, 0], (1, 0))   # (nb, bs)
        return blocks[:, :, None] * inv_sig[:, None, :]           # (nb, Nwin, bs)

    # --- build stacked lane-major A / b for all windows (glue) ---------------
    def _build_A_b(self, params_dict, bs, N):
        max_K = max(self.K_list)
        n_win = N // max_K
        A_wins, b_wins = [], []
        for w in range(n_win):
            i = w * max_K
            A_parts, b_parts = [], []
            flg1 = False
            for agg in self.aggregates:
                for K in self.K_list:
                    idx_1 = i // K
                    idx_2 = idx_1 + max_K // K
                    use = (K == 1 and not flg1) or (K > 1)
                    if K == 1 and not flg1:
                        flg1 = True
                    if not use:
                        continue
                    means = params_dict[agg][K][0][:, idx_1:idx_2, :]
                    stds = params_dict[agg][K][1][:, idx_1:idx_2, :]
                    A_parts.append(self._get_A_lm(agg, K, max_K, stds))
                    b_parts.append(
                        jnp.transpose((means / stds)[:, :, 0], (1, 0)))  # (nb, bs)
            A_wins.append(jnp.concatenate(A_parts, axis=0))   # (M, max_K, bs)
            b_wins.append(jnp.concatenate(b_parts, axis=0))   # (M, bs)
        A_lm = jnp.stack(A_wins, axis=2)                       # (M, max_K, n_win, bs)
        b_lm = jnp.stack(b_wins, axis=1)                       # (M, n_win, bs)
        M = A_lm.shape[0]
        A_lm = A_lm.reshape(M, max_K, n_win * bs)              # problem p = w*bs + b
        b_lm = b_lm.reshape(M, n_win * bs)
        return A_lm, b_lm, n_win, max_K

    def solve_base_level_mean(self, params_dict, bs, N):
        A_lm, b_lm, n_win, max_K = self._build_A_b(params_dict, bs, N)
        x = batched_lstsq(A_lm, b_lm,
                          min_pallas_batch=self.pallas_min_batch)  # (n_win*bs, K)
        x = x.reshape(n_win, bs, max_K)
        return jnp.transpose(x, (1, 0, 2)).reshape(bs, n_win * max_K, 1)

    def forward(self, params_dict):
        base_lvl = self.aggregates[0]
        means1 = params_dict[base_lvl][1][0]
        bs, N = means1.shape[0], means1.shape[1]
        if self.solve_mean:
            base_lvl_mu = self.solve_base_level_mean(params_dict, bs, N)
        else:
            base_lvl_mu = means1
        base_lvl_std = params_dict[base_lvl][1][1]
        # initialize_params parity (x_mu, x_d, x_v)
        self.x_mu = jnp.squeeze(base_lvl_mu, -1)
        self.x_d = jnp.squeeze(base_lvl_std, -1) ** 2
        self.x_v = jnp.ones((base_lvl_mu.shape[0], base_lvl_mu.shape[1], 4),
                            jnp.float32) * 0.01
        if self.solve_std:
            # TODO(synk): Adam/KL inner optimisation loop not implemented in Pallas.
            raise NotImplementedError("solve_std=True path not ported")
        all_preds_mu = base_lvl_mu
        all_preds_std = base_lvl_std
        all_preds_d = params_dict[base_lvl][1][2]
        all_preds_v = params_dict[base_lvl][1][3]
        return all_preds_mu, all_preds_d, all_preds_v, all_preds_std


# -----------------------------------------------------------------------------
# main
# -----------------------------------------------------------------------------
if __name__ == "__main__":
    key = jax.random.PRNGKey(0)
    bs, N = 2, 8
    K_list = [1, 2, 4]
    aggregates = ['sum', 'slope']

    # Synthetic params_dict (in the original these come from base forecasting
    # models in get_params_dict): [means, stds, d, v] per (agg, level).
    params_dict = {}
    for agg in aggregates:
        params_dict[agg] = {}
        for K in K_list:
            key, k1, k2 = jax.random.split(key, 3)
            n_lvl = N // K
            means = jax.random.normal(k1, (bs, n_lvl, 1), jnp.float32)
            stds = 0.5 + jnp.abs(jax.random.normal(k2, (bs, n_lvl, 1), jnp.float32))
            d = stds ** 2
            v = jnp.ones_like(means) * 1e-9
            params_dict[agg][K] = [means, stds, d, v]

    # pallas_min_batch=1 forces the Pallas path even at this tiny demo size
    # (the default of 256 keeps the fused-XLA fallback for small batches).
    model = KLInferenceSGD(K_list, aggregates, lr=0.01,
                           solve_mean=True, solve_std=False,
                           opt_normspace=True, kldirection='qp',
                           covariance=False, pallas_min_batch=1)

    mu, d_out, v_out, std_out = model.forward(params_dict)
    jax.block_until_ready((mu, d_out, v_out, std_out))

    # Pure-JAX reference for the Pallas least-squares hot path.
    A_lm, b_lm, n_win, max_K = model._build_A_b(params_dict, bs, N)
    x_ref = batched_lstsq_reference(A_lm, b_lm)                    # (B, K)
    mu_ref = jnp.transpose(x_ref.reshape(n_win, bs, max_K),
                           (1, 0, 2)).reshape(bs, N, 1)

    assert mu.shape == (bs, N, 1)
    assert std_out.shape == (bs, N, 1)
    assert d_out.shape == (bs, N, 1)
    assert v_out.shape == (bs, N, 1)
    assert jnp.allclose(mu, mu_ref, rtol=1e-4, atol=1e-4)

    print("KERNEL_OK")
</pallas_src>

<mosaic_0001>
module attributes {stable_mosaic.version = 11 : i64} {
  func.func @_lstsq_kernel(%arg0: i32, %arg1: memref<40x8x256xf32, #tpu.memory_space<vmem>>, %arg2: memref<10x8x256xf32, #tpu.memory_space<vmem>>, %arg3: memref<4x8x256xf32, #tpu.memory_space<vmem>>) attributes {dimension_semantics = [#tpu.dimension_semantics<parallel>], iteration_bounds = array<i64: 1>, scalar_prefetch = 0 : i64, scratch_operands = 0 : i64, tpu.core_type = #tpu.core_type<tc>, window_params = [{transform_indices = @transform_0, window_bounds = array<i64: 40, 8, 256>}, {transform_indices = @transform_1, window_bounds = array<i64: 10, 8, 256>}, {transform_indices = @transform_2, window_bounds = array<i64: 4, 8, 256>}]} {
    %c0 = arith.constant 0 : index
    %c0_0 = arith.constant 0 : index
    %c0_1 = arith.constant 0 : index
    %0 = vector.load %arg1[%c0, %c0_0, %c0_1] : memref<40x8x256xf32, #tpu.memory_space<vmem>>, vector<1x8x256xf32>
    %1 = vector.shape_cast %0 : vector<1x8x256xf32> to vector<8x256xf32>
    %c1 = arith.constant 1 : index
    %c0_2 = arith.constant 0 : index
    %c0_3 = arith.constant 0 : index
    %2 = vector.load %arg1[%c1, %c0_2, %c0_3] : memref<40x8x256xf32, #tpu.memory_space<vmem>>, vector<1x8x256xf32>
    %3 = vector.shape_cast %2 : vector<1x8x256xf32> to vector<8x256xf32>
    %c2 = arith.constant 2 : index
    %c0_4 = arith.constant 0 : index
    %c0_5 = arith.constant 0 : index
    %4 = vector.load %arg1[%c2, %c0_4, %c0_5] : memref<40x8x256xf32, #tpu.memory_space<vmem>>, vector<1x8x256xf32>
    %5 = vector.shape_cast %4 : vector<1x8x256xf32> to vector<8x256xf32>
    %c3 = arith.constant 3 : index
    %c0_6 = arith.constant 0 : index
    %c0_7 = arith.constant 0 : index
    %6 = vector.load %arg1[%c3, %c0_6, %c0_7] : memref<40x8x256xf32, #tpu.memory_space<vmem>>, vector<1x8x256xf32>
    %7 = vector.shape_cast %6 : vector<1x8x256xf32> to vector<8x256xf32>
    %c0_8 = arith.constant 0 : index
    %c0_9 = arith.constant 0 : index
    %c0_10 = arith.constant 0 : index
    %8 = vector.load %arg2[%c0_8, %c0_9, %c0_10] : memref<10x8x256xf32, #tpu.memory_space<vmem>>, vector<1x8x256xf32>
    %9 = vector.shape_cast %8 : vector<1x8x256xf32> to vector<8x256xf32>
    %10 = arith.mulf %1, %1 : vector<8x256xf32>
    %11 = arith.mulf %1, %3 : vector<8x256xf32>
    %12 = arith.mulf %1, %5 : vector<8x256xf32>
    %13 = arith.mulf %1, %7 : vector<8x256xf32>
    %14 = arith.mulf %1, %9 : vector<8x256xf32>
    %15 = arith.mulf %3, %3 : vector<8x256xf32>
    %16 = arith.mulf %3, %5 : vector<8x256xf32>
    %17 = arith.mulf %3, %7 : vector<8x256xf32>
    %18 = arith.mulf %3, %9 : vector<8x256xf32>
    %19 = arith.mulf %5, %5 : vector<8x256xf32>
    %20 = arith.mulf %5, %7 : vector<8x256xf32>
    %21 = arith.mulf %5, %9 : vector<8x256xf32>
    %22 = arith.mulf %7, %7 : vector<8x256xf32>
    %23 = arith.mulf %7, %9 : vector<8x256xf32>
    %c4 = arith.constant 4 : index
    %c0_11 = arith.constant 0 : index
    %c0_12 = arith.constant 0 : index
    %24 = vector.load %arg1[%c4, %c0_11, %c0_12] : memref<40x8x256xf32, #tpu.memory_space<vmem>>, vector<1x8x256xf32>
    %25 = vector.shape_cast %24 : vector<1x8x256xf32> to vector<8x256xf32>
    %c5 = arith.constant 5 : index
    %c0_13 = arith.constant 0 : index
    %c0_14 = arith.constant 0 : index
    %26 = vector.load %arg1[%c5, %c0_13, %c0_14] : memref<40x8x256xf32, #tpu.memory_space<vmem>>, vector<1x8x256xf32>
    %27 = vector.shape_cast %26 : vector<1x8x256xf32> to vector<8x256xf32>
    %c6 = arith.constant 6 : index
    %c0_15 = arith.constant 0 : index
    %c0_16 = arith.constant 0 : index
    %28 = vector.load %arg1[%c6, %c0_15, %c0_16] : memref<40x8x256xf32, #tpu.memory_space<vmem>>, vector<1x8x256xf32>
    %29 = vector.shape_cast %28 : vector<1x8x256xf32> to vector<8x256xf32>
    %c7 = arith.constant 7 : index
    %c0_17 = arith.constant 0 : index
    %c0_18 = arith.constant 0 : index
    %30 = vector.load %arg1[%c7, %c0_17, %c0_18] : memref<40x8x256xf32, #tpu.memory_space<vmem>>, vector<1x8x256xf32>
    %31 = vector.shape_cast %30 : vector<1x8x256xf32> to vector<8x256xf32>
    %c1_19 = arith.constant 1 : index
    %c0_20 = arith.constant 0 : index
    %c0_21 = arith.constant 0 : index
    %32 = vector.load %arg2[%c1_19, %c0_20, %c0_21] : memref<10x8x256xf32, #tpu.memory_space<vmem>>, vector<1x8x256xf32>
    %33 = vector.shape_cast %32 : vector<1x8x256xf32> to vector<8x256xf32>
    %34 = arith.mulf %25, %25 : vector<8x256xf32>
    %35 = arith.addf %10, %34 : vector<8x256xf32>
    %36 = arith.mulf %25, %27 : vector<8x256xf32>
    %37 = arith.addf %11, %36 : vector<8x256xf32>
    %38 = arith.mulf %25, %29 : vector<8x256xf32>
    %39 = arith.addf %12, %38 : vector<8x256xf32>
    %40 = arith.mulf %25, %31 : vector<8x256xf32>
    %41 = arith.addf %13, %40 : vector<8x256xf32>
    %42 = arith.mulf %25, %33 : vector<8x256xf32>
    %43 = arith.addf %14, %42 : vector<8x256xf32>
    %44 = arith.mulf %27, %27 : vector<8x256xf32>
    %45 = arith.addf %15, %44 : vector<8x256xf32>
    %46 = arith.mulf %27, %29 : vector<8x256xf32>
    %47 = arith.addf %16, %46 : vector<8x256xf32>
    %48 = arith.mulf %27, %31 : vector<8x256xf32>
    %49 = arith.addf %17, %48 : vector<8x256xf32>
    %50 = arith.mulf %27, %33 : vector<8x256xf32>
    %51 = arith.addf %18, %50 : vector<8x256xf32>
    %52 = arith.mulf %29, %29 : vector<8x256xf32>
    %53 = arith.addf %19, %52 : vector<8x256xf32>
    %54 = arith.mulf %29, %31 : vector<8x256xf32>
    %55 = arith.addf %20, %54 : vector<8x256xf32>
    %56 = arith.mulf %29, %33 : vector<8x256xf32>
    %57 = arith.addf %21, %56 : vector<8x256xf32>
    %58 = arith.mulf %31, %31 : vector<8x256xf32>
    %59 = arith.addf %22, %58 : vector<8x256xf32>
    %60 = arith.mulf %31, %33 : vector<8x256xf32>
    %61 = arith.addf %23, %60 : vector<8x256xf32>
    %c8 = arith.constant 8 : index
    %c0_22 = arith.constant 0 : index
    %c0_23 = arith.constant 0 : index
    %62 = vector.load %arg1[%c8, %c0_22, %c0_23] : memref<40x8x256xf32, #tpu.memory_space<vmem>>, vector<1x8x256xf32>
    %63 = vector.shape_cast %62 : vector<1x8x256xf32> to vector<8x256xf32>
    %c9 = arith.constant 9 : index
    %c0_24 = arith.constant 0 : index
    %c0_25 = arith.constant 0 : index
    %64 = vector.load %arg1[%c9, %c0_24, %c0_25] : memref<40x8x256xf32, #tpu.memory_space<vmem>>, vector<1x8x256xf32>
    %65 = vector.shape_cast %64 : vector<1x8x256xf32> to vector<8x256xf32>
    %c10 = arith.constant 10 : index
    %c0_26 = arith.constant 0 : index
    %c0_27 = arith.constant 0 : index
    %66 = vector.load %arg1[%c10, %c0_26, %c0_27] : memref<40x8x256xf32, #tpu.memory_space<vmem>>, vector<1x8x256xf32>
    %67 = vector.shape_cast %66 : vector<1x8x256xf32> to vector<8x256xf32>
    %c11 = arith.constant 11 : index
    %c0_28 = arith.constant 0 : index
    %c0_29 = arith.constant 0 : index
    %68 = vector.load %arg1[%c11, %c0_28, %c0_29] : memref<40x8x256xf32, #tpu.memory_space<vmem>>, vector<1x8x256xf32>
    %69 = vector.shape_cast %68 : vector<1x8x256xf32> to vector<8x256xf32>
    %c2_30 = arith.constant 2 : index
    %c0_31 = arith.constant 0 : index
    %c0_32 = arith.constant 0 : index
    %70 = vector.load %arg2[%c2_30, %c0_31, %c0_32] : memref<10x8x256xf32, #tpu.memory_space<vmem>>, vector<1x8x256xf32>
    %71 = vector.shape_cast %70 : vector<1x8x256xf32> to vector<8x256xf32>
    %72 = arith.mulf %63, %63 : vector<8x256xf32>
    %73 = arith.addf %35, %72 : vector<8x256xf32>
    %74 = arith.mulf %63, %65 : vector<8x256xf32>
    %75 = arith.addf %37, %74 : vector<8x256xf32>
    %76 = arith.mulf %63, %67 : vector<8x256xf32>
    %77 = arith.addf %39, %76 : vector<8x256xf32>
    %78 = arith.mulf %63, %69 : vector<8x256xf32>
    %79 = arith.addf %41, %78 : vector<8x256xf32>
    %80 = arith.mulf %63, %71 : vector<8x256xf32>
    %81 = arith.addf %43, %80 : vector<8x256xf32>
    %82 = arith.mulf %65, %65 : vector<8x256xf32>
    %83 = arith.addf %45, %82 : vector<8x256xf32>
    %84 = arith.mulf %65, %67 : vector<8x256xf32>
    %85 = arith.addf %47, %84 : vector<8x256xf32>
    %86 = arith.mulf %65, %69 : vector<8x256xf32>
    %87 = arith.addf %49, %86 : vector<8x256xf32>
    %88 = arith.mulf %65, %71 : vector<8x256xf32>
    %89 = arith.addf %51, %88 : vector<8x256xf32>
    %90 = arith.mulf %67, %67 : vector<8x256xf32>
    %91 = arith.addf %53, %90 : vector<8x256xf32>
    %92 = arith.mulf %67, %69 : vector<8x256xf32>
    %93 = arith.addf %55, %92 : vector<8x256xf32>
    %94 = arith.mulf %67, %71 : vector<8x256xf32>
    %95 = arith.addf %57, %94 : vector<8x256xf32>
    %96 = arith.mulf %69, %69 : vector<8x256xf32>
    %97 = arith.addf %59, %96 : vector<8x256xf32>
    %98 = arith.mulf %69, %71 : vector<8x256xf32>
    %99 = arith.addf %61, %98 : vector<8x256xf32>
    %c12 = arith.constant 12 : index
    %c0_33 = arith.constant 0 : index
    %c0_34 = arith.constant 0 : index
    %100 = vector.load %arg1[%c12, %c0_33, %c0_34] : memref<40x8x256xf32, #tpu.memory_space<vmem>>, vector<1x8x256xf32>
    %101 = vector.shape_cast %100 : vector<1x8x256xf32> to vector<8x256xf32>
    %c13 = arith.constant 13 : index
    %c0_35 = arith.constant 0 : index
    %c0_36 = arith.constant 0 : index
    %102 = vector.load %arg1[%c13, %c0_35, %c0_36] : memref<40x8x256xf32, #tpu.memory_space<vmem>>, vector<1x8x256xf32>
    %103 = vector.shape_cast %102 : vector<1x8x256xf32> to vector<8x256xf32>
    %c14 = arith.constant 14 : index
    %c0_37 = arith.constant 0 : index
    %c0_38 = arith.constant 0 : index
    %104 = vector.load %arg1[%c14, %c0_37, %c0_38] : memref<40x8x256xf32, #tpu.memory_space<vmem>>, vector<1x8x256xf32>
    %105 = vector.shape_cast %104 : vector<1x8x256xf32> to vector<8x256xf32>
    %c15 = arith.constant 15 : index
    %c0_39 = arith.constant 0 : index
    %c0_40 = arith.constant 0 : index
    %106 = vector.load %arg1[%c15, %c0_39, %c0_40] : memref<40x8x256xf32, #tpu.memory_space<vmem>>, vector<1x8x256xf32>
    %107 = vector.shape_cast %106 : vector<1x8x256xf32> to vector<8x256xf32>
    %c3_41 = arith.constant 3 : index
    %c0_42 = arith.constant 0 : index
    %c0_43 = arith.constant 0 : index
    %108 = vector.load %arg2[%c3_41, %c0_42, %c0_43] : memref<10x8x256xf32, #tpu.memory_space<vmem>>, vector<1x8x256xf32>
    %109 = vector.shape_cast %108 : vector<1x8x256xf32> to vector<8x256xf32>
    %110 = arith.mulf %101, %101 : vector<8x256xf32>
    %111 = arith.addf %73, %110 : vector<8x256xf32>
    %112 = arith.mulf %101, %103 : vector<8x256xf32>
    %113 = arith.addf %75, %112 : vector<8x256xf32>
    %114 = arith.mulf %101, %105 : vector<8x256xf32>
    %115 = arith.addf %77, %114 : vector<8x256xf32>
    %116 = arith.mulf %101, %107 : vector<8x256xf32>
    %117 = arith.addf %79, %116 : vector<8x256xf32>
    %118 = arith.mulf %101, %109 : vector<8x256xf32>
    %119 = arith.addf %81, %118 : vector<8x256xf32>
    %120 = arith.mulf %103, %103 : vector<8x256xf32>
    %121 = arith.addf %83, %120 : vector<8x256xf32>
    %122 = arith.mulf %103, %105 : vector<8x256xf32>
    %123 = arith.addf %85, %122 : vector<8x256xf32>
    %124 = arith.mulf %103, %107 : vector<8x256xf32>
    %125 = arith.addf %87, %124 : vector<8x256xf32>
    %126 = arith.mulf %103, %109 : vector<8x256xf32>
    %127 = arith.addf %89, %126 : vector<8x256xf32>
    %128 = arith.mulf %105, %105 : vector<8x256xf32>
    %129 = arith.addf %91, %128 : vector<8x256xf32>
    %130 = arith.mulf %105, %107 : vector<8x256xf32>
    %131 = arith.addf %93, %130 : vector<8x256xf32>
    %132 = arith.mulf %105, %109 : vector<8x256xf32>
    %133 = arith.addf %95, %132 : vector<8x256xf32>
    %134 = arith.mulf %107, %107 : vector<8x256xf32>
    %135 = arith.addf %97, %134 : vector<8x256xf32>
    %136 = arith.mulf %107, %109 : vector<8x256xf32>
    %137 = arith.addf %99, %136 : vector<8x256xf32>
    %c16 = arith.constant 16 : index
    %c0_44 = arith.constant 0 : index
    %c0_45 = arith.constant 0 : index
    %138 = vector.load %arg1[%c16, %c0_44, %c0_45] : memref<40x8x256xf32, #tpu.memory_space<vmem>>, vector<1x8x256xf32>
    %139 = vector.shape_cast %138 : vector<1x8x256xf32> to vector<8x256xf32>
    %c17 = arith.constant 17 : index
    %c0_46 = arith.constant 0 : index
    %c0_47 = arith.constant 0 : index
    %140 = vector.load %arg1[%c17, %c0_46, %c0_47] : memref<40x8x256xf32, #tpu.memory_space<vmem>>, vector<1x8x256xf32>
    %141 = vector.shape_cast %140 : vector<1x8x256xf32> to vector<8x256xf32>
    %c18 = arith.constant 18 : index
    %c0_48 = arith.constant 0 : index
    %c0_49 = arith.constant 0 : index
    %142 = vector.load %arg1[%c18, %c0_48, %c0_49] : memref<40x8x256xf32, #tpu.memory_space<vmem>>, vector<1x8x256xf32>
    %143 = vector.shape_cast %142 : vector<1x8x256xf32> to vector<8x256xf32>
    %c19 = arith.constant 19 : index
    %c0_50 = arith.constant 0 : index
    %c0_51 = arith.constant 0 : index
    %144 = vector.load %arg1[%c19, %c0_50, %c0_51] : memref<40x8x256xf32, #tpu.memory_space<vmem>>, vector<1x8x256xf32>
    %145 = vector.shape_cast %144 : vector<1x8x256xf32> to vector<8x256xf32>
    %c4_52 = arith.constant 4 : index
    %c0_53 = arith.constant 0 : index
    %c0_54 = arith.constant 0 : index
    %146 = vector.load %arg2[%c4_52, %c0_53, %c0_54] : memref<10x8x256xf32, #tpu.memory_space<vmem>>, vector<1x8x256xf32>
    %147 = vector.shape_cast %146 : vector<1x8x256xf32> to vector<8x256xf32>
    %148 = arith.mulf %139, %139 : vector<8x256xf32>
    %149 = arith.addf %111, %148 : vector<8x256xf32>
    %150 = arith.mulf %139, %141 : vector<8x256xf32>
    %151 = arith.addf %113, %150 : vector<8x256xf32>
    %152 = arith.mulf %139, %143 : vector<8x256xf32>
    %153 = arith.addf %115, %152 : vector<8x256xf32>
    %154 = arith.mulf %139, %145 : vector<8x256xf32>
    %155 = arith.addf %117, %154 : vector<8x256xf32>
    %156 = arith.mulf %139, %147 : vector<8x256xf32>
    %157 = arith.addf %119, %156 : vector<8x256xf32>
    %158 = arith.mulf %141, %141 : vector<8x256xf32>
    %159 = arith.addf %121, %158 : vector<8x256xf32>
    %160 = arith.mulf %141, %143 : vector<8x256xf32>
    %161 = arith.addf %123, %160 : vector<8x256xf32>
    %162 = arith.mulf %141, %145 : vector<8x256xf32>
    %163 = arith.addf %125, %162 : vector<8x256xf32>
    %164 = arith.mulf %141, %147 : vector<8x256xf32>
    %165 = arith.addf %127, %164 : vector<8x256xf32>
    %166 = arith.mulf %143, %143 : vector<8x256xf32>
    %167 = arith.addf %129, %166 : vector<8x256xf32>
    %168 = arith.mulf %143, %145 : vector<8x256xf32>
    %169 = arith.addf %131, %168 : vector<8x256xf32>
    %170 = arith.mulf %143, %147 : vector<8x256xf32>
    %171 = arith.addf %133, %170 : vector<8x256xf32>
    %172 = arith.mulf %145, %145 : vector<8x256xf32>
    %173 = arith.addf %135, %172 : vector<8x256xf32>
    %174 = arith.mulf %145, %147 : vector<8x256xf32>
    %175 = arith.addf %137, %174 : vector<8x256xf32>
    %c20 = arith.constant 20 : index
    %c0_55 = arith.constant 0 : index
    %c0_56 = arith.constant 0 : index
    %176 = vector.load %arg1[%c20, %c0_55, %c0_56] : memref<40x8x256xf32, #tpu.memory_space<vmem>>, vector<1x8x256xf32>
    %177 = vector.shape_cast %176 : vector<1x8x256xf32> to vector<8x256xf32>
    %c21 = arith.constant 21 : index
    %c0_57 = arith.constant 0 : index
    %c0_58 = arith.constant 0 : index
    %178 = vector.load %arg1[%c21, %c0_57, %c0_58] : memref<40x8x256xf32, #tpu.memory_space<vmem>>, vector<1x8x256xf32>
    %179 = vector.shape_cast %178 : vector<1x8x256xf32> to vector<8x256xf32>
    %c22 = arith.constant 22 : index
    %c0_59 = arith.constant 0 : index
    %c0_60 = arith.constant 0 : index
    %180 = vector.load %arg1[%c22, %c0_59, %c0_60] : memref<40x8x256xf32, #tpu.memory_space<vmem>>, vector<1x8x256xf32>
    %181 = vector.shape_cast %180 : vector<1x8x256xf32> to vector<8x256xf32>
    %c23 = arith.constant 23 : index
    %c0_61 = arith.constant 0 : index
    %c0_62 = arith.constant 0 : index
    %182 = vector.load %arg1[%c23, %c0_61, %c0_62] : memref<40x8x256xf32, #tpu.memory_space<vmem>>, vector<1x8x256xf32>
    %183 = vector.shape_cast %182 : vector<1x8x256xf32> to vector<8x256xf32>
    %c5_63 = arith.constant 5 : index
    %c0_64 = arith.constant 0 : index
    %c0_65 = arith.constant 0 : index
    %184 = vector.load %arg2[%c5_63, %c0_64, %c0_65] : memref<10x8x256xf32, #tpu.memory_space<vmem>>, vector<1x8x256xf32>
    %185 = vector.shape_cast %184 : vector<1x8x256xf32> to vector<8x256xf32>
    %186 = arith.mulf %177, %177 : vector<8x256xf32>
    %187 = arith.addf %149, %186 : vector<8x256xf32>
    %188 = arith.mulf %177, %179 : vector<8x256xf32>
    %189 = arith.addf %151, %188 : vector<8x256xf32>
    %190 = arith.mulf %177, %181 : vector<8x256xf32>
    %191 = arith.addf %153, %190 : vector<8x256xf32>
    %192 = arith.mulf %177, %183 : vector<8x256xf32>
    %193 = arith.addf %155, %192 : vector<8x256xf32>
    %194 = arith.mulf %177, %185 : vector<8x256xf32>
    %195 = arith.addf %157, %194 : vector<8x256xf32>
    %196 = arith.mulf %179, %179 : vector<8x256xf32>
    %197 = arith.addf %159, %196 : vector<8x256xf32>
    %198 = arith.mulf %179, %181 : vector<8x256xf32>
    %199 = arith.addf %161, %198 : vector<8x256xf32>
    %200 = arith.mulf %179, %183 : vector<8x256xf32>
    %201 = arith.addf %163, %200 : vector<8x256xf32>
    %202 = arith.mulf %179, %185 : vector<8x256xf32>
    %203 = arith.addf %165, %202 : vector<8x256xf32>
    %204 = arith.mulf %181, %181 : vector<8x256xf32>
    %205 = arith.addf %167, %204 : vector<8x256xf32>
    %206 = arith.mulf %181, %183 : vector<8x256xf32>
    %207 = arith.addf %169, %206 : vector<8x256xf32>
    %208 = arith.mulf %181, %185 : vector<8x256xf32>
    %209 = arith.addf %171, %208 : vector<8x256xf32>
    %210 = arith.mulf %183, %183 : vector<8x256xf32>
    %211 = arith.addf %173, %210 : vector<8x256xf32>
    %212 = arith.mulf %183, %185 : vector<8x256xf32>
    %213 = arith.addf %175, %212 : vector<8x256xf32>
    %c24 = arith.constant 24 : index
    %c0_66 = arith.constant 0 : index
    %c0_67 = arith.constant 0 : index
    %214 = vector.load %arg1[%c24, %c0_66, %c0_67] : memref<40x8x256xf32, #tpu.memory_space<vmem>>, vector<1x8x256xf32>
    %215 = vector.shape_cast %214 : vector<1x8x256xf32> to vector<8x256xf32>
    %c25 = arith.constant 25 : index
    %c0_68 = arith.constant 0 : index
    %c0_69 = arith.constant 0 : index
    %216 = vector.load %arg1[%c25, %c0_68, %c0_69] : memref<40x8x256xf32, #tpu.memory_space<vmem>>, vector<1x8x256xf32>
    %217 = vector.shape_cast %216 : vector<1x8x256xf32> to vector<8x256xf32>
    %c26 = arith.constant 26 : index
    %c0_70 = arith.constant 0 : index
    %c0_71 = arith.constant 0 : index
    %218 = vector.load %arg1[%c26, %c0_70, %c0_71] : memref<40x8x256xf32, #tpu.memory_space<vmem>>, vector<1x8x256xf32>
    %219 = vector.shape_cast %218 : vector<1x8x256xf32> to vector<8x256xf32>
    %c27 = arith.constant 27 : index
    %c0_72 = arith.constant 0 : index
    %c0_73 = arith.constant 0 : index
    %220 = vector.load %arg1[%c27, %c0_72, %c0_73] : memref<40x8x256xf32, #tpu.memory_space<vmem>>, vector<1x8x256xf32>
    %221 = vector.shape_cast %220 : vector<1x8x256xf32> to vector<8x256xf32>
    %c6_74 = arith.constant 6 : index
    %c0_75 = arith.constant 0 : index
    %c0_76 = arith.constant 0 : index
    %222 = vector.load %arg2[%c6_74, %c0_75, %c0_76] : memref<10x8x256xf32, #tpu.memory_space<vmem>>, vector<1x8x256xf32>
    %223 = vector.shape_cast %222 : vector<1x8x256xf32> to vector<8x256xf32>
    %224 = arith.mulf %215, %215 : vector<8x256xf32>
    %225 = arith.addf %187, %224 : vector<8x256xf32>
    %226 = arith.mulf %215, %217 : vector<8x256xf32>
    %227 = arith.addf %189, %226 : vector<8x256xf32>
    %228 = arith.mulf %215, %219 : vector<8x256xf32>
    %229 = arith.addf %191, %228 : vector<8x256xf32>
    %230 = arith.mulf %215, %221 : vector<8x256xf32>
    %231 = arith.addf %193, %230 : vector<8x256xf32>
    %232 = arith.mulf %215, %223 : vector<8x256xf32>
    %233 = arith.addf %195, %232 : vector<8x256xf32>
    %234 = arith.mulf %217, %217 : vector<8x256xf32>
    %235 = arith.addf %197, %234 : vector<8x256xf32>
    %236 = arith.mulf %217, %219 : vector<8x256xf32>
    %237 = arith.addf %199, %236 : vector<8x256xf32>
    %238 = arith.mulf %217, %221 : vector<8x256xf32>
    %239 = arith.addf %201, %238 : vector<8x256xf32>
    %240 = arith.mulf %217, %223 : vector<8x256xf32>
    %241 = arith.addf %203, %240 : vector<8x256xf32>
    %242 = arith.mulf %219, %219 : vector<8x256xf32>
    %243 = arith.addf %205, %242 : vector<8x256xf32>
    %244 = arith.mulf %219, %221 : vector<8x256xf32>
    %245 = arith.addf %207, %244 : vector<8x256xf32>
    %246 = arith.mulf %219, %223 : vector<8x256xf32>
    %247 = arith.addf %209, %246 : vector<8x256xf32>
    %248 = arith.mulf %221, %221 : vector<8x256xf32>
    %249 = arith.addf %211, %248 : vector<8x256xf32>
    %250 = arith.mulf %221, %223 : vector<8x256xf32>
    %251 = arith.addf %213, %250 : vector<8x256xf32>
    %c28 = arith.constant 28 : index
    %c0_77 = arith.constant 0 : index
    %c0_78 = arith.constant 0 : index
    %252 = vector.load %arg1[%c28, %c0_77, %c0_78] : memref<40x8x256xf32, #tpu.memory_space<vmem>>, vector<1x8x256xf32>
    %253 = vector.shape_cast %252 : vector<1x8x256xf32> to vector<8x256xf32>
    %c29 = arith.constant 29 : index
    %c0_79 = arith.constant 0 : index
    %c0_80 = arith.constant 0 : index
    %254 = vector.load %arg1[%c29, %c0_79, %c0_80] : memref<40x8x256xf32, #tpu.memory_space<vmem>>, vector<1x8x256xf32>
    %255 = vector.shape_cast %254 : vector<1x8x256xf32> to vector<8x256xf32>
    %c30 = arith.constant 30 : index
    %c0_81 = arith.constant 0 : index
    %c0_82 = arith.constant 0 : index
    %256 = vector.load %arg1[%c30, %c0_81, %c0_82] : memref<40x8x256xf32, #tpu.memory_space<vmem>>, vector<1x8x256xf32>
    %257 = vector.shape_cast %256 : vector<1x8x256xf32> to vector<8x256xf32>
    %c31 = arith.constant 31 : index
    %c0_83 = arith.constant 0 : index
    %c0_84 = arith.constant 0 : index
    %258 = vector.load %arg1[%c31, %c0_83, %c0_84] : memref<40x8x256xf32, #tpu.memory_space<vmem>>, vector<1x8x256xf32>
    %259 = vector.shape_cast %258 : vector<1x8x256xf32> to vector<8x256xf32>
    %c7_85 = arith.constant 7 : index
    %c0_86 = arith.constant 0 : index
    %c0_87 = arith.constant 0 : index
    %260 = vector.load %arg2[%c7_85, %c0_86, %c0_87] : memref<10x8x256xf32, #tpu.memory_space<vmem>>, vector<1x8x256xf32>
    %261 = vector.shape_cast %260 : vector<1x8x256xf32> to vector<8x256xf32>
    %262 = arith.mulf %253, %253 : vector<8x256xf32>
    %263 = arith.addf %225, %262 : vector<8x256xf32>
    %264 = arith.mulf %253, %255 : vector<8x256xf32>
    %265 = arith.addf %227, %264 : vector<8x256xf32>
    %266 = arith.mulf %253, %257 : vector<8x256xf32>
    %267 = arith.addf %229, %266 : vector<8x256xf32>
    %268 = arith.mulf %253, %259 : vector<8x256xf32>
    %269 = arith.addf %231, %268 : vector<8x256xf32>
    %270 = arith.mulf %253, %261 : vector<8x256xf32>
    %271 = arith.addf %233, %270 : vector<8x256xf32>
    %272 = arith.mulf %255, %255 : vector<8x256xf32>
    %273 = arith.addf %235, %272 : vector<8x256xf32>
    %274 = arith.mulf %255, %257 : vector<8x256xf32>
    %275 = arith.addf %237, %274 : vector<8x256xf32>
    %276 = arith.mulf %255, %259 : vector<8x256xf32>
    %277 = arith.addf %239, %276 : vector<8x256xf32>
    %278 = arith.mulf %255, %261 : vector<8x256xf32>
    %279 = arith.addf %241, %278 : vector<8x256xf32>
    %280 = arith.mulf %257, %257 : vector<8x256xf32>
    %281 = arith.addf %243, %280 : vector<8x256xf32>
    %282 = arith.mulf %257, %259 : vector<8x256xf32>
    %283 = arith.addf %245, %282 : vector<8x256xf32>
    %284 = arith.mulf %257, %261 : vector<8x256xf32>
    %285 = arith.addf %247, %284 : vector<8x256xf32>
    %286 = arith.mulf %259, %259 : vector<8x256xf32>
    %287 = arith.addf %249, %286 : vector<8x256xf32>
    %288 = arith.mulf %259, %261 : vector<8x256xf32>
    %289 = arith.addf %251, %288 : vector<8x256xf32>
    %c32 = arith.constant 32 : index
    %c0_88 = arith.constant 0 : index
    %c0_89 = arith.constant 0 : index
    %290 = vector.load %arg1[%c32, %c0_88, %c0_89] : memref<40x8x256xf32, #tpu.memory_space<vmem>>, vector<1x8x256xf32>
    %291 = vector.shape_cast %290 : vector<1x8x256xf32> to vector<8x256xf32>
    %c33 = arith.constant 33 : index
    %c0_90 = arith.constant 0 : index
    %c0_91 = arith.constant 0 : index
    %292 = vector.load %arg1[%c33, %c0_90, %c0_91] : memref<40x8x256xf32, #tpu.memory_space<vmem>>, vector<1x8x256xf32>
    %293 = vector.shape_cast %292 : vector<1x8x256xf32> to vector<8x256xf32>
    %c34 = arith.constant 34 : index
    %c0_92 = arith.constant 0 : index
    %c0_93 = arith.constant 0 : index
    %294 = vector.load %arg1[%c34, %c0_92, %c0_93] : memref<40x8x256xf32, #tpu.memory_space<vmem>>, vector<1x8x256xf32>
    %295 = vector.shape_cast %294 : vector<1x8x256xf32> to vector<8x256xf32>
    %c35 = arith.constant 35 : index
    %c0_94 = arith.constant 0 : index
    %c0_95 = arith.constant 0 : index
    %296 = vector.load %arg1[%c35, %c0_94, %c0_95] : memref<40x8x256xf32, #tpu.memory_space<vmem>>, vector<1x8x256xf32>
    %297 = vector.shape_cast %296 : vector<1x8x256xf32> to vector<8x256xf32>
    %c8_96 = arith.constant 8 : index
    %c0_97 = arith.constant 0 : index
    %c0_98 = arith.constant 0 : index
    %298 = vector.load %arg2[%c8_96, %c0_97, %c0_98] : memref<10x8x256xf32, #tpu.memory_space<vmem>>, vector<1x8x256xf32>
    %299 = vector.shape_cast %298 : vector<1x8x256xf32> to vector<8x256xf32>
    %300 = arith.mulf %291, %291 : vector<8x256xf32>
    %301 = arith.addf %263, %300 : vector<8x256xf32>
    %302 = arith.mulf %291, %293 : vector<8x256xf32>
    %303 = arith.addf %265, %302 : vector<8x256xf32>
    %304 = arith.mulf %291, %295 : vector<8x256xf32>
    %305 = arith.addf %267, %304 : vector<8x256xf32>
    %306 = arith.mulf %291, %297 : vector<8x256xf32>
    %307 = arith.addf %269, %306 : vector<8x256xf32>
    %308 = arith.mulf %291, %299 : vector<8x256xf32>
    %309 = arith.addf %271, %308 : vector<8x256xf32>
    %310 = arith.mulf %293, %293 : vector<8x256xf32>
    %311 = arith.addf %273, %310 : vector<8x256xf32>
    %312 = arith.mulf %293, %295 : vector<8x256xf32>
    %313 = arith.addf %275, %312 : vector<8x256xf32>
    %314 = arith.mulf %293, %297 : vector<8x256xf32>
    %315 = arith.addf %277, %314 : vector<8x256xf32>
    %316 = arith.mulf %293, %299 : vector<8x256xf32>
    %317 = arith.addf %279, %316 : vector<8x256xf32>
    %318 = arith.mulf %295, %295 : vector<8x256xf32>
    %319 = arith.addf %281, %318 : vector<8x256xf32>
    %320 = arith.mulf %295, %297 : vector<8x256xf32>
    %321 = arith.addf %283, %320 : vector<8x256xf32>
    %322 = arith.mulf %295, %299 : vector<8x256xf32>
    %323 = arith.addf %285, %322 : vector<8x256xf32>
    %324 = arith.mulf %297, %297 : vector<8x256xf32>
    %325 = arith.addf %287, %324 : vector<8x256xf32>
    %326 = arith.mulf %297, %299 : vector<8x256xf32>
    %327 = arith.addf %289, %326 : vector<8x256xf32>
    %c36 = arith.constant 36 : index
    %c0_99 = arith.constant 0 : index
    %c0_100 = arith.constant 0 : index
    %328 = vector.load %arg1[%c36, %c0_99, %c0_100] : memref<40x8x256xf32, #tpu.memory_space<vmem>>, vector<1x8x256xf32>
    %329 = vector.shape_cast %328 : vector<1x8x256xf32> to vector<8x256xf32>
    %c37 = arith.constant 37 : index
    %c0_101 = arith.constant 0 : index
    %c0_102 = arith.constant 0 : index
    %330 = vector.load %arg1[%c37, %c0_101, %c0_102] : memref<40x8x256xf32, #tpu.memory_space<vmem>>, vector<1x8x256xf32>
    %331 = vector.shape_cast %330 : vector<1x8x256xf32> to vector<8x256xf32>
    %c38 = arith.constant 38 : index
    %c0_103 = arith.constant 0 : index
    %c0_104 = arith.constant 0 : index
    %332 = vector.load %arg1[%c38, %c0_103, %c0_104] : memref<40x8x256xf32, #tpu.memory_space<vmem>>, vector<1x8x256xf32>
    %333 = vector.shape_cast %332 : vector<1x8x256xf32> to vector<8x256xf32>
    %c39 = arith.constant 39 : index
    %c0_105 = arith.constant 0 : index
    %c0_106 = arith.constant 0 : index
    %334 = vector.load %arg1[%c39, %c0_105, %c0_106] : memref<40x8x256xf32, #tpu.memory_space<vmem>>, vector<1x8x256xf32>
    %335 = vector.shape_cast %334 : vector<1x8x256xf32> to vector<8x256xf32>
    %c9_107 = arith.constant 9 : index
    %c0_108 = arith.constant 0 : index
    %c0_109 = arith.constant 0 : index
    %336 = vector.load %arg2[%c9_107, %c0_108, %c0_109] : memref<10x8x256xf32, #tpu.memory_space<vmem>>, vector<1x8x256xf32>
    %337 = vector.shape_cast %336 : vector<1x8x256xf32> to vector<8x256xf32>
    %338 = arith.mulf %329, %329 : vector<8x256xf32>
    %339 = arith.addf %301, %338 : vector<8x256xf32>
    %340 = arith.mulf %329, %331 : vector<8x256xf32>
    %341 = arith.addf %303, %340 : vector<8x256xf32>
    %342 = arith.mulf %329, %333 : vector<8x256xf32>
    %343 = arith.addf %305, %342 : vector<8x256xf32>
    %344 = arith.mulf %329, %335 : vector<8x256xf32>
    %345 = arith.addf %307, %344 : vector<8x256xf32>
    %346 = arith.mulf %329, %337 : vector<8x256xf32>
    %347 = arith.addf %309, %346 : vector<8x256xf32>
    %348 = arith.mulf %331, %331 : vector<8x256xf32>
    %349 = arith.addf %311, %348 : vector<8x256xf32>
    %350 = arith.mulf %331, %333 : vector<8x256xf32>
    %351 = arith.addf %313, %350 : vector<8x256xf32>
    %352 = arith.mulf %331, %335 : vector<8x256xf32>
    %353 = arith.addf %315, %352 : vector<8x256xf32>
    %354 = arith.mulf %331, %337 : vector<8x256xf32>
    %355 = arith.addf %317, %354 : vector<8x256xf32>
    %356 = arith.mulf %333, %333 : vector<8x256xf32>
    %357 = arith.addf %319, %356 : vector<8x256xf32>
    %358 = arith.mulf %333, %335 : vector<8x256xf32>
    %359 = arith.addf %321, %358 : vector<8x256xf32>
    %360 = arith.mulf %333, %337 : vector<8x256xf32>
    %361 = arith.addf %323, %360 : vector<8x256xf32>
    %362 = arith.mulf %335, %335 : vector<8x256xf32>
    %363 = arith.addf %325, %362 : vector<8x256xf32>
    %364 = arith.mulf %335, %337 : vector<8x256xf32>
    %365 = arith.addf %327, %364 : vector<8x256xf32>
    %cst = arith.constant 9.99999996E-13 : f32
    %366 = vector.broadcast %cst : f32 to vector<8x256xf32>
    %367 = arith.addf %339, %366 : vector<8x256xf32>
    %368 = tpu.reciprocal %367 {approx = true} : vector<8x256xf32> -> vector<8x256xf32>
    %369 = arith.mulf %367, %368 : vector<8x256xf32>
    %cst_110 = arith.constant 2.000000e+00 : f32
    %370 = vector.broadcast %cst_110 : f32 to vector<8x256xf32>
    %371 = arith.subf %370, %369 : vector<8x256xf32>
    %372 = arith.mulf %368, %371 : vector<8x256xf32>
    %373 = arith.mulf %341, %372 : vector<8x256xf32>
    %374 = arith.mulf %343, %372 : vector<8x256xf32>
    %375 = arith.mulf %345, %372 : vector<8x256xf32>
    %376 = arith.mulf %347, %372 : vector<8x256xf32>
    %377 = arith.mulf %341, %373 : vector<8x256xf32>
    %378 = arith.subf %349, %377 : vector<8x256xf32>
    %379 = arith.mulf %341, %374 : vector<8x256xf32>
    %380 = arith.subf %351, %379 : vector<8x256xf32>
    %381 = arith.mulf %341, %375 : vector<8x256xf32>
    %382 = arith.subf %353, %381 : vector<8x256xf32>
    %383 = arith.mulf %341, %376 : vector<8x256xf32>
    %384 = arith.subf %355, %383 : vector<8x256xf32>
    %385 = arith.mulf %343, %373 : vector<8x256xf32>
    %386 = arith.subf %351, %385 : vector<8x256xf32>
    %387 = arith.mulf %343, %374 : vector<8x256xf32>
    %388 = arith.subf %357, %387 : vector<8x256xf32>
    %389 = arith.mulf %343, %375 : vector<8x256xf32>
    %390 = arith.subf %359, %389 : vector<8x256xf32>
    %391 = arith.mulf %343, %376 : vector<8x256xf32>
    %392 = arith.subf %361, %391 : vector<8x256xf32>
    %393 = arith.mulf %345, %373 : vector<8x256xf32>
    %394 = arith.subf %353, %393 : vector<8x256xf32>
    %395 = arith.mulf %345, %374 : vector<8x256xf32>
    %396 = arith.subf %359, %395 : vector<8x256xf32>
    %397 = arith.mulf %345, %375 : vector<8x256xf32>
    %398 = arith.subf %363, %397 : vector<8x256xf32>
    %399 = arith.mulf %345, %376 : vector<8x256xf32>
    %400 = arith.subf %365, %399 : vector<8x256xf32>
    %cst_111 = arith.constant 9.99999996E-13 : f32
    %401 = vector.broadcast %cst_111 : f32 to vector<8x256xf32>
    %402 = arith.addf %378, %401 : vector<8x256xf32>
    %403 = tpu.reciprocal %402 {approx = true} : vector<8x256xf32> -> vector<8x256xf32>
    %404 = arith.mulf %402, %403 : vector<8x256xf32>
    %cst_112 = arith.constant 2.000000e+00 : f32
    %405 = vector.broadcast %cst_112 : f32 to vector<8x256xf32>
    %406 = arith.subf %405, %404 : vector<8x256xf32>
    %407 = arith.mulf %403, %406 : vector<8x256xf32>
    %408 = arith.mulf %380, %407 : vector<8x256xf32>
    %409 = arith.mulf %382, %407 : vector<8x256xf32>
    %410 = arith.mulf %384, %407 : vector<8x256xf32>
    %411 = arith.mulf %373, %408 : vector<8x256xf32>
    %412 = arith.subf %374, %411 : vector<8x256xf32>
    %413 = arith.mulf %373, %409 : vector<8x256xf32>
    %414 = arith.subf %375, %413 : vector<8x256xf32>
    %415 = arith.mulf %373, %410 : vector<8x256xf32>
    %416 = arith.subf %376, %415 : vector<8x256xf32>
    %417 = arith.mulf %386, %408 : vector<8x256xf32>
    %418 = arith.subf %388, %417 : vector<8x256xf32>
    %419 = arith.mulf %386, %409 : vector<8x256xf32>
    %420 = arith.subf %390, %419 : vector<8x256xf32>
    %421 = arith.mulf %386, %410 : vector<8x256xf32>
    %422 = arith.subf %392, %421 : vector<8x256xf32>
    %423 = arith.mulf %394, %408 : vector<8x256xf32>
    %424 = arith.subf %396, %423 : vector<8x256xf32>
    %425 = arith.mulf %394, %409 : vector<8x256xf32>
    %426 = arith.subf %398, %425 : vector<8x256xf32>
    %427 = arith.mulf %394, %410 : vector<8x256xf32>
    %428 = arith.subf %400, %427 : vector<8x256xf32>
    %cst_113 = arith.constant 9.99999996E-13 : f32
    %429 = vector.broadcast %cst_113 : f32 to vector<8x256xf32>
    %430 = arith.addf %418, %429 : vector<8x256xf32>
    %431 = tpu.reciprocal %430 {approx = true} : vector<8x256xf32> -> vector<8x256xf32>
    %432 = arith.mulf %430, %431 : vector<8x256xf32>
    %cst_114 = arith.constant 2.000000e+00 : f32
    %433 = vector.broadcast %cst_114 : f32 to vector<8x256xf32>
    %434 = arith.subf %433, %432 : vector<8x256xf32>
    %435 = arith.mulf %431, %434 : vector<8x256xf32>
    %436 = arith.mulf %420, %435 : vector<8x256xf32>
    %437 = arith.mulf %422, %435 : vector<8x256xf32>
    %438 = arith.mulf %412, %436 : vector<8x256xf32>
    %439 = arith.subf %414, %438 : vector<8x256xf32>
    %440 = arith.mulf %412, %437 : vector<8x256xf32>
    %441 = arith.subf %416, %440 : vector<8x256xf32>
    %442 = arith.mulf %408, %436 : vector<8x256xf32>
    %443 = arith.subf %409, %442 : vector<8x256xf32>
    %444 = arith.mulf %408, %437 : vector<8x256xf32>
    %445 = arith.subf %410, %444 : vector<8x256xf32>
    %446 = arith.mulf %424, %436 : vector<8x256xf32>
    %447 = arith.subf %426, %446 : vector<8x256xf32>
    %448 = arith.mulf %424, %437 : vector<8x256xf32>
    %449 = arith.subf %428, %448 : vector<8x256xf32>
    %cst_115 = arith.constant 9.99999996E-13 : f32
    %450 = vector.broadcast %cst_115 : f32 to vector<8x256xf32>
    %451 = arith.addf %447, %450 : vector<8x256xf32>
    %452 = tpu.reciprocal %451 {approx = true} : vector<8x256xf32> -> vector<8x256xf32>
    %453 = arith.mulf %451, %452 : vector<8x256xf32>
    %cst_116 = arith.constant 2.000000e+00 : f32
    %454 = vector.broadcast %cst_116 : f32 to vector<8x256xf32>
    %455 = arith.subf %454, %453 : vector<8x256xf32>
    %456 = arith.mulf %452, %455 : vector<8x256xf32>
    %457 = arith.mulf %449, %456 : vector<8x256xf32>
    %458 = arith.mulf %439, %457 : vector<8x256xf32>
    %459 = arith.subf %441, %458 : vector<8x256xf32>
    %460 = arith.mulf %443, %457 : vector<8x256xf32>
    %461 = arith.subf %445, %460 : vector<8x256xf32>
    %462 = arith.mulf %436, %457 : vector<8x256xf32>
    %463 = arith.subf %437, %462 : vector<8x256xf32>
    %c0_117 = arith.constant 0 : index
    %c0_118 = arith.constant 0 : index
    %c0_119 = arith.constant 0 : index
    %464 = vector.load %arg3[%c0_117, %c0_118, %c0_119] : memref<4x8x256xf32, #tpu.memory_space<vmem>>, vector<1x8x256xf32>
    %465 = vector.shape_cast %464 : vector<1x8x256xf32> to vector<8x256xf32>
    %466 = vector.shape_cast %459 : vector<8x256xf32> to vector<1x8x256xf32>
    tpu.vector_store %arg3[%c0_117, %c0_118, %c0_119], %466 {strides = array<i32>} : memref<4x8x256xf32, #tpu.memory_space<vmem>>, vector<1x8x256xf32>,
    %c1_120 = arith.constant 1 : index
    %c0_121 = arith.constant 0 : index
    %c0_122 = arith.constant 0 : index
    %467 = vector.load %arg3[%c1_120, %c0_121, %c0_122] : memref<4x8x256xf32, #tpu.memory_space<vmem>>, vector<1x8x256xf32>
    %468 = vector.shape_cast %467 : vector<1x8x256xf32> to vector<8x256xf32>
    %469 = vector.shape_cast %461 : vector<8x256xf32> to vector<1x8x256xf32>
    tpu.vector_store %arg3[%c1_120, %c0_121, %c0_122], %469 {strides = array<i32>} : memref<4x8x256xf32, #tpu.memory_space<vmem>>, vector<1x8x256xf32>,
    %c2_123 = arith.constant 2 : index
    %c0_124 = arith.constant 0 : index
    %c0_125 = arith.constant 0 : index
    %470 = vector.load %arg3[%c2_123, %c0_124, %c0_125] : memref<4x8x256xf32, #tpu.memory_space<vmem>>, vector<1x8x256xf32>
    %471 = vector.shape_cast %470 : vector<1x8x256xf32> to vector<8x256xf32>
    %472 = vector.shape_cast %463 : vector<8x256xf32> to vector<1x8x256xf32>
    tpu.vector_store %arg3[%c2_123, %c0_124, %c0_125], %472 {strides = array<i32>} : memref<4x8x256xf32, #tpu.memory_space<vmem>>, vector<1x8x256xf32>,
    %c3_126 = arith.constant 3 : index
    %c0_127 = arith.constant 0 : index
    %c0_128 = arith.constant 0 : index
    %473 = vector.load %arg3[%c3_126, %c0_127, %c0_128] : memref<4x8x256xf32, #tpu.memory_space<vmem>>, vector<1x8x256xf32>
    %474 = vector.shape_cast %473 : vector<1x8x256xf32> to vector<8x256xf32>
    %475 = vector.shape_cast %457 : vector<8x256xf32> to vector<1x8x256xf32>
    tpu.vector_store %arg3[%c3_126, %c0_127, %c0_128], %475 {strides = array<i32>} : memref<4x8x256xf32, #tpu.memory_space<vmem>>, vector<1x8x256xf32>,
    return
  }
  func.func @transform_0(%arg0: i32) -> (i32, i32, i32) {
    %c0_i32 = arith.constant 0 : i32
    %c0_i32_0 = arith.constant 0 : i32
    %c0_i32_1 = arith.constant 0 : i32
    return %c0_i32, %c0_i32_0, %arg0 : i32, i32, i32
  }
  func.func @transform_1(%arg0: i32) -> (i32, i32, i32) {
    %c0_i32 = arith.constant 0 : i32
    %c0_i32_0 = arith.constant 0 : i32
    %c0_i32_1 = arith.constant 0 : i32
    return %c0_i32, %c0_i32_0, %arg0 : i32, i32, i32
  }
  func.func @transform_2(%arg0: i32) -> (i32, i32, i32) {
    %c0_i32 = arith.constant 0 : i32
    %c0_i32_0 = arith.constant 0 : i32
    %c0_i32_1 = arith.constant 0 : i32
    return %c0_i32, %c0_i32_0, %arg0 : i32, i32, i32
  }
}

</mosaic_0001>

<bundles_post_ra>
// kernel: tpu_custom_call.1
= control target key start
LH: loop header
LB: loop body
LE: loop exit
PB: predicated region body
PF: predicated region fallthrough
CT: control target
= control target key end

     0   :  { %7 = vsyncpa [#allocation3], 0  ;;  %s2166_s0 = inlined_call_operand.hbm [shape: f32[40,8,256], index: 0, kind: input, shape index: {}]   ;;  %s2167_s1 = inlined_call_operand.hbm [shape: f32[10,8,256], index: 1, kind: input, shape index: {}]   ;;  %s2168_s2 = inlined_call_operand.hbm [shape: f32[4,8,256], index: 2, kind: output, shape index: {}]  }
   0x1   :  { %8 = vsyncpa [#allocation6], 0 }
   0x2   :  { %9 = vsyncpa [#allocation4], 0  ;;  %s14_s11 = sshll.u32 %s2166_s0, 4  ;;  %s1034_s12 = smov [#allocation2]   ;;  %s15_s11 = int_to_ptr.hbm [resolvable:$true] %s14_s11 }
   0x3   :  { %s16_s13 = sshll.u32 %s1034_s12, 4  ;;  %s27_s16 = sshll.u32 %s2167_s1, 4  ;;  %s17_s13 = int_to_ptr.vmem [resolvable:$true] %s16_s13  ;;  %s28_s16 = int_to_ptr.hbm [resolvable:$true] %s27_s16 }
   0x4   :  { %s1035_s17 = smov 256   ;;  %s1036_s18 = smov 16  }
   0x5   :  { %22 = dma.hbm_to_vmem [thread:$0]  %s15_s11, 10240, %s17_s13, [#allocation3], %s1035_s17, %s1035_s17, %s1036_s18  }
   0x6   :  { %s1037_s19 = smov [#allocation5]  }
   0x7   :  { %s29_s20 = sshll.u32 %s1037_s19, 4  ;;  %s30_s20 = int_to_ptr.vmem [resolvable:$true] %s29_s20 }
   0x8   :  { %35 = dma.hbm_to_vmem [thread:$0]  %s28_s16, 2560, %s30_s20, [#allocation6], %s1035_s17, %s1035_s17, %s1036_s18  }
   0x9   :  { %1028 = dma.done.wait [#allocation3], 10240  }
   0xa   :  { %1029 = vsyncadd [#allocation3], 4294957056 }
   0xb   :  { %1030 = dma.done.wait [#allocation6], 2560  }
   0xc   :  { %1031 = vsyncadd [#allocation6], 4294964736  ;;  %v44_v0 = vld [vmem:[#allocation2] sm:$0xff]  ;;  %v45_v1 = vld [vmem:[#allocation2 + $0x8] sm:$0xff]  ;;  %s1038_s0 = smov [#allocation7]   ;;  %s921_s23 = sshll.u32 %s2168_s2, 4  ;;  %s922_s23 = int_to_ptr.hbm [resolvable:$true] %s921_s23 }
   0xd   :  { %v47_v2 = vld [vmem:[#allocation2 + $0x10] sm:$0xff]  ;;  %v48_v3 = vld [vmem:[#allocation2 + $0x18] sm:$0xff]  ;;  %v50_v4 = vld [vmem:[#allocation2 + $0x20] sm:$0xff]  ;;  %v57_v10 = vmul.f32 %v44_v0, %v44_v0  ;;  %v58_v11 = vmul.f32 %v45_v1, %v45_v1  ;;  %s919_s1 = sshll.u32 %s1038_s0, 4  ;;  %s920_s1 = int_to_ptr.vmem [resolvable:$true] %s919_s1 }
   0xe   :  { %v51_v5 = vld [vmem:[#allocation2 + $0x28] sm:$0xff]  ;;  %v53_v6 = vld [vmem:[#allocation2 + $0x30] sm:$0xff]  ;;  %v54_v7 = vld [vmem:[#allocation2 + $0x38] sm:$0xff]  ;;  %v59_v12 = vmul.f32 %v47_v2, %v44_v0  ;;  %v1066_v13 = vmul.f32 %v47_v2, %v47_v2  ;;  %v60_v14 = vmul.f32 %v48_v3, %v45_v1  ;;  %v61_v15 = vmul.f32 %v50_v4, %v44_v0 }
   0xf   :  { %v55_v8 = vld [vmem:[#allocation5] sm:$0xff]  ;;  %v56_v9 = vld [vmem:[#allocation5 + $0x8] sm:$0xff]  ;;  %v62_v16 = vmul.f32 %v51_v5, %v45_v1  ;;  %v68_v17 = vmul.f32 %v48_v3, %v48_v3  ;;  %v63_v18 = vmul.f32 %v53_v6, %v44_v0  ;;  %v64_v19 = vmul.f32 %v54_v7, %v45_v1  ;;  %v89_v28 = vld [vmem:[#allocation2 + $0x50] sm:$0xff] }
  0x10   :  { %v65_v20 = vmul.f32 %v55_v8, %v44_v0  ;;  %v69_v21 = vmul.f32 %v50_v4, %v47_v2  ;;  %v86_v22 = vld [vmem:[#allocation2 + $0x40] sm:$0xff]  ;;  %v87_v23 = vld [vmem:[#allocation2 + $0x48] sm:$0xff]  ;;  %v66_v24 = vmul.f32 %v56_v9, %v45_v1  ;;  %v70_v25 = vmul.f32 %v51_v5, %v48_v3  ;;  %v90_v29 = vld [vmem:[#allocation2 + $0x58] sm:$0xff] }
  0x11   :  { %v71_v26 = vmul.f32 %v53_v6, %v47_v2  ;;  %v72_v27 = vmul.f32 %v54_v7, %v48_v3  ;;  %v73_v30 = vmul.f32 %v55_v8, %v47_v2  ;;  %v74_v31 = vmul.f32 %v56_v9, %v48_v3  ;;  %v92_v34 = vld [vmem:[#allocation2 + $0x60] sm:$0xff]  ;;  %v93_v35 = vld [vmem:[#allocation2 + $0x68] sm:$0xff]  ;;  %v95_v38 = vld [vmem:[#allocation2 + $0x70] sm:$0xff] }
  0x12   :  { %v1068_v32 = vmul.f32 %v50_v4, %v50_v4  ;;  %v1070_v33 = vmul.f32 %v51_v5, %v51_v5  ;;  %v1072_v36 = vmul.f32 %v53_v6, %v50_v4  ;;  %v1074_v37 = vmul.f32 %v54_v7, %v51_v5  ;;  %v96_v39 = vld [vmem:[#allocation2 + $0x78] sm:$0xff]  ;;  %v98_v44 = vld [vmem:[#allocation5 + $0x10] sm:$0xff] }
  0x13   :  { %v100_v40 = vmul.f32 %v86_v22, %v86_v22  ;;  %v101_v41 = vmul.f32 %v87_v23, %v87_v23  ;;  %v1076_v42 = vmul.f32 %v55_v8, %v50_v4  ;;  %v1078_v43 = vmul.f32 %v56_v9, %v51_v5  ;;  %v99_v45 = vld [vmem:[#allocation5 + $0x18] sm:$0xff] }
  0x14   :  { %v104_v46 = vmul.f32 %v89_v28, %v86_v22  ;;  %v105_v47 = vmul.f32 %v90_v29, %v87_v23  ;;  %v1080_v48 = vmul.f32 %v53_v6, %v53_v6  ;;  %v1082_v49 = vmul.f32 %v54_v7, %v54_v7 }
  0x15   :  { %v108_v50 = vmul.f32 %v92_v34, %v86_v22  ;;  %v109_v51 = vmul.f32 %v93_v35, %v87_v23  ;;  %v1084_v52 = vmul.f32 %v55_v8, %v53_v6  ;;  %v1086_v53 = vmul.f32 %v56_v9, %v54_v7 }
  0x16   :  { %v112_v54 = vmul.f32 %v95_v38, %v86_v22  ;;  %v113_v55 = vmul.f32 %v96_v39, %v87_v23  ;;  %v1088_v56 = vadd.f32 %v100_v40, %v57_v10  ;;  %v1090_v57 = vadd.f32 %v101_v41, %v58_v11  ;;  %v158_v41 = vld [vmem:[#allocation2 + $0x88] sm:$0xff] }
  0x17   :  { %v116_v58 = vmul.f32 %v98_v44, %v86_v22  ;;  %v117_v59 = vmul.f32 %v99_v45, %v87_v23  ;;  %v1092_v60 = vadd.f32 %v104_v46, %v59_v12  ;;  %v1094_v61 = vadd.f32 %v105_v47, %v60_v14 }
  0x18   :  { %v120_v62 = vmul.f32 %v89_v28, %v89_v28  ;;  %v121_v63 = vmul.f32 %v90_v29, %v90_v29  ;;  %v1096_v0 = vadd.f32 %v108_v50, %v61_v15  ;;  %v1098_v1 = vadd.f32 %v109_v51, %v62_v16  ;;  %v161_v50 = vld [vmem:[#allocation2 + $0x98] sm:$0xff] }
  0x19   :  { %v124_v2 = vmul.f32 %v92_v34, %v89_v28  ;;  %v125_v3 = vmul.f32 %v93_v35, %v90_v29  ;;  %v1100_v4 = vadd.f32 %v112_v54, %v63_v18  ;;  %v1102_v5 = vadd.f32 %v113_v55, %v64_v19  ;;  %v167_v55 = vld [vmem:[#allocation2 + $0xb8] sm:$0xff] }
  0x1a   :  { %v128_v6 = vmul.f32 %v95_v38, %v89_v28  ;;  %v129_v7 = vmul.f32 %v96_v39, %v90_v29  ;;  %v1104_v8 = vadd.f32 %v116_v58, %v65_v20  ;;  %v1106_v9 = vadd.f32 %v117_v59, %v66_v24 }
  0x1b   :  { %v132_v10 = vmul.f32 %v98_v44, %v89_v28  ;;  %v133_v11 = vmul.f32 %v99_v45, %v90_v29  ;;  %v1109_v12 = vadd.f32 %v120_v62, %v1066_v13  ;;  %v1111_v14 = vadd.f32 %v121_v63, %v68_v17  ;;  %v157_v29 = vld [vmem:[#allocation2 + $0x80] sm:$0xff] }
  0x1c   :  { %v136_v15 = vmul.f32 %v92_v34, %v92_v34  ;;  %v137_v16 = vmul.f32 %v93_v35, %v93_v35  ;;  %v1113_v22 = vadd.f32 %v124_v2, %v69_v21  ;;  %v1115_v18 = vadd.f32 %v125_v3, %v70_v25  ;;  %v160_v21 = vld [vmem:[#allocation2 + $0x90] sm:$0xff] }
  0x1d   :  { %v140_v19 = vmul.f32 %v95_v38, %v92_v34  ;;  %v141_v23 = vmul.f32 %v96_v39, %v93_v35  ;;  %v1117_v40 = vadd.f32 %v128_v6, %v71_v26  ;;  %v1119_v20 = vadd.f32 %v129_v7, %v72_v27 }
  0x1e   :  { %v144_v24 = vmul.f32 %v98_v44, %v92_v34  ;;  %v145_v28 = vmul.f32 %v99_v45, %v93_v35  ;;  %v1121_v13 = vadd.f32 %v132_v10, %v73_v30  ;;  %v1123_v17 = vadd.f32 %v133_v11, %v74_v31  ;;  %v163_v34 = vld [vmem:[#allocation2 + $0xa0] sm:$0xff]  ;;  %v164_v35 = vld [vmem:[#allocation2 + $0xa8] sm:$0xff]  ;;  %v166_v31 = vld [vmem:[#allocation2 + $0xb0] sm:$0xff] }
  0x1f   :  { %v148_v46 = vmul.f32 %v95_v38, %v95_v38  ;;  %v149_v47 = vmul.f32 %v96_v39, %v96_v39  ;;  %v1126_v25 = vadd.f32 %v136_v15, %v1068_v32  ;;  %v1129_v26 = vadd.f32 %v137_v16, %v1070_v33 }
  0x20   :  { %v152_v27 = vmul.f32 %v98_v44, %v95_v38  ;;  %v153_v51 = vmul.f32 %v99_v45, %v96_v39  ;;  %v1132_v54 = vadd.f32 %v140_v19, %v1072_v36  ;;  %v1135_v30 = vadd.f32 %v141_v23, %v1074_v37  ;;  %v169_v38 = vld [vmem:[#allocation5 + $0x20] sm:$0xff]  ;;  %v170_v39 = vld [vmem:[#allocation5 + $0x28] sm:$0xff] }
  0x21   :  { %v171_v58 = vmul.f32 %v157_v29, %v157_v29  ;;  %v172_v59 = vmul.f32 %v158_v41, %v158_v41  ;;  %v1138_v32 = vadd.f32 %v144_v24, %v1076_v42  ;;  %v1141_v33 = vadd.f32 %v145_v28, %v1078_v43 }
  0x22   :  { %v175_v44 = vmul.f32 %v160_v21, %v157_v29  ;;  %v176_v45 = vmul.f32 %v161_v50, %v158_v41  ;;  %v1144_v36 = vadd.f32 %v148_v46, %v1080_v48  ;;  %v1147_v37 = vadd.f32 %v149_v47, %v1082_v49 }
  0x23   :  { %v179_v62 = vmul.f32 %v163_v34, %v157_v29  ;;  %v180_v63 = vmul.f32 %v164_v35, %v158_v41  ;;  %v1150_v2 = vadd.f32 %v152_v27, %v1084_v52  ;;  %v1153_v42 = vadd.f32 %v153_v51, %v1086_v53  ;;  %v229_v51 = vld [vmem:[#allocation2 + $0xc8] sm:$0xff] }
  0x24   :  { %v183_v43 = vmul.f32 %v166_v31, %v157_v29  ;;  %v184_v3 = vmul.f32 %v167_v55, %v158_v41  ;;  %v1156_v6 = vadd.f32 %v171_v58, %v1088_v56  ;;  %v1159_v7 = vadd.f32 %v172_v59, %v1090_v57 }
  0x25   :  { %v187_v48 = vmul.f32 %v169_v38, %v157_v29  ;;  %v188_v10 = vmul.f32 %v170_v39, %v158_v41  ;;  %v1162_v49 = vadd.f32 %v175_v44, %v1092_v60  ;;  %v1165_v11 = vadd.f32 %v176_v45, %v1094_v61  ;;  %v231_v44 = vld [vmem:[#allocation2 + $0xd0] sm:$0xff]  ;;  %v232_v45 = vld [vmem:[#allocation2 + $0xd8] sm:$0xff] }
  0x26   :  { %v191_v52 = vmul.f32 %v160_v21, %v160_v21  ;;  %v192_v15 = vmul.f32 %v161_v50, %v161_v50  ;;  %v1168_v53 = vadd.f32 %v179_v62, %v1096_v0  ;;  %v1171_v16 = vadd.f32 %v180_v63, %v1098_v1  ;;  %v234_v62 = vld [vmem:[#allocation2 + $0xe0] sm:$0xff]  ;;  %v235_v63 = vld [vmem:[#allocation2 + $0xe8] sm:$0xff] }
  0x27   :  { %v195_v56 = vmul.f32 %v163_v34, %v160_v21  ;;  %v196_v19 = vmul.f32 %v164_v35, %v161_v50  ;;  %v1174_v57 = vadd.f32 %v183_v43, %v1100_v4  ;;  %v1177_v23 = vadd.f32 %v184_v3, %v1102_v5  ;;  %v237_v43 = vld [vmem:[#allocation2 + $0xf0] sm:$0xff]  ;;  %v238_v3 = vld [vmem:[#allocation2 + $0xf8] sm:$0xff] }
  0x28   :  { %v199_v60 = vmul.f32 %v166_v31, %v160_v21  ;;  %v200_v24 = vmul.f32 %v167_v55, %v161_v50  ;;  %v1180_v61 = vadd.f32 %v187_v48, %v1104_v8  ;;  %v1183_v28 = vadd.f32 %v188_v10, %v1106_v9 }
  0x29   :  { %v203_v0 = vmul.f32 %v169_v38, %v160_v21  ;;  %v204_v29 = vmul.f32 %v170_v39, %v161_v50  ;;  %v1186_v1 = vadd.f32 %v191_v52, %v1109_v12  ;;  %v1189_v41 = vadd.f32 %v192_v15, %v1111_v14  ;;  %v228_v14 = vld [vmem:[#allocation2 + $0xc0] sm:$0xff] }
  0x2a   :  { %v207_v4 = vmul.f32 %v163_v34, %v163_v34  ;;  %v208_v46 = vmul.f32 %v164_v35, %v164_v35  ;;  %v1192_v5 = vadd.f32 %v195_v56, %v1113_v22  ;;  %v1195_v47 = vadd.f32 %v196_v19, %v1115_v18 }
  0x2b   :  { %v211_v8 = vmul.f32 %v166_v31, %v163_v34  ;;  %v212_v27 = vmul.f32 %v167_v55, %v164_v35  ;;  %v1198_v9 = vadd.f32 %v199_v60, %v1117_v40  ;;  %v1201_v21 = vadd.f32 %v200_v24, %v1119_v20 }
  0x2c   :  { %v215_v12 = vmul.f32 %v169_v38, %v163_v34  ;;  %v216_v50 = vmul.f32 %v170_v39, %v164_v35  ;;  %v1204_v58 = vadd.f32 %v203_v0, %v1121_v13  ;;  %v1207_v22 = vadd.f32 %v204_v29, %v1123_v17 }
  0x2d   :  { %v219_v18 = vmul.f32 %v166_v31, %v166_v31  ;;  %v220_v59 = vmul.f32 %v167_v55, %v167_v55  ;;  %v1210_v40 = vadd.f32 %v207_v4, %v1126_v25  ;;  %v1213_v20 = vadd.f32 %v208_v46, %v1129_v26 }
  0x2e   :  { %v223_v34 = vmul.f32 %v169_v38, %v166_v31  ;;  %v224_v35 = vmul.f32 %v170_v39, %v167_v55  ;;  %v1216_v13 = vadd.f32 %v211_v8, %v1132_v54  ;;  %v1219_v17 = vadd.f32 %v212_v27, %v1135_v30  ;;  %v240_v31 = vld [vmem:[#allocation5 + $0x30] sm:$0xff]  ;;  %v241_v55 = vld [vmem:[#allocation5 + $0x38] sm:$0xff] }
  0x2f   :  { %v242_v48 = vmul.f32 %v228_v14, %v228_v14  ;;  %v243_v10 = vmul.f32 %v229_v51, %v229_v51  ;;  %v1222_v25 = vadd.f32 %v215_v12, %v1138_v32  ;;  %v1225_v26 = vadd.f32 %v216_v50, %v1141_v33 }
  0x30   :  { %v246_v38 = vmul.f32 %v231_v44, %v228_v14  ;;  %v247_v39 = vmul.f32 %v232_v45, %v229_v51  ;;  %v1228_v54 = vadd.f32 %v219_v18, %v1144_v36  ;;  %v1231_v30 = vadd.f32 %v220_v59, %v1147_v37 }
  0x31   :  { %v250_v52 = vmul.f32 %v234_v62, %v228_v14  ;;  %v251_v15 = vmul.f32 %v235_v63, %v229_v51  ;;  %v1234_v56 = vadd.f32 %v223_v34, %v1150_v2  ;;  %v1237_v32 = vadd.f32 %v224_v35, %v1153_v42  ;;  %v300_v35 = vld [vmem:[#allocation2 + $0x108] sm:$0xff] }
  0x32   :  { %v254_v33 = vmul.f32 %v237_v43, %v228_v14  ;;  %v255_v19 = vmul.f32 %v238_v3, %v229_v51  ;;  %v1240_v60 = vadd.f32 %v242_v48, %v1156_v6  ;;  %v1243_v24 = vadd.f32 %v243_v10, %v1159_v7 }
  0x33   :  { %v258_v36 = vmul.f32 %v240_v31, %v228_v14  ;;  %v259_v0 = vmul.f32 %v241_v55, %v229_v51  ;;  %v1246_v37 = vadd.f32 %v246_v38, %v1162_v49  ;;  %v1249_v29 = vadd.f32 %v247_v39, %v1165_v11  ;;  %v302_v38 = vld [vmem:[#allocation2 + $0x110] sm:$0xff]  ;;  %v303_v39 = vld [vmem:[#allocation2 + $0x118] sm:$0xff] }
  0x34   :  { %v262_v2 = vmul.f32 %v231_v44, %v231_v44  ;;  %v263_v4 = vmul.f32 %v232_v45, %v232_v45  ;;  %v1252_v42 = vadd.f32 %v250_v52, %v1168_v53  ;;  %v1255_v46 = vadd.f32 %v251_v15, %v1171_v16  ;;  %v305_v52 = vld [vmem:[#allocation2 + $0x120] sm:$0xff]  ;;  %v306_v15 = vld [vmem:[#allocation2 + $0x128] sm:$0xff] }
  0x35   :  { %v266_v6 = vmul.f32 %v234_v62, %v231_v44  ;;  %v267_v8 = vmul.f32 %v235_v63, %v232_v45  ;;  %v1258_v7 = vadd.f32 %v254_v33, %v1174_v57  ;;  %v1261_v27 = vadd.f32 %v255_v19, %v1177_v23  ;;  %v308_v33 = vld [vmem:[#allocation2 + $0x130] sm:$0xff]  ;;  %v309_v19 = vld [vmem:[#allocation2 + $0x138] sm:$0xff] }
  0x36   :  { %v270_v49 = vmul.f32 %v237_v43, %v231_v44  ;;  %v271_v12 = vmul.f32 %v238_v3, %v232_v45  ;;  %v1264_v11 = vadd.f32 %v258_v36, %v1180_v61  ;;  %v1267_v50 = vadd.f32 %v259_v0, %v1183_v28 }
  0x37   :  { %v274_v53 = vmul.f32 %v240_v31, %v231_v44  ;;  %v275_v14 = vmul.f32 %v241_v55, %v232_v45  ;;  %v1270_v16 = vadd.f32 %v262_v2, %v1186_v1  ;;  %v1273_v51 = vadd.f32 %v263_v4, %v1189_v41  ;;  %v299_v41 = vld [vmem:[#allocation2 + $0x100] sm:$0xff] }
  0x38   :  { %v278_v57 = vmul.f32 %v234_v62, %v234_v62  ;;  %v279_v18 = vmul.f32 %v235_v63, %v235_v63  ;;  %v1276_v23 = vadd.f32 %v266_v6, %v1192_v5  ;;  %v1279_v59 = vadd.f32 %v267_v8, %v1195_v47 }
  0x39   :  { %v282_v61 = vmul.f32 %v237_v43, %v234_v62  ;;  %v283_v34 = vmul.f32 %v238_v3, %v235_v63  ;;  %v1282_v28 = vadd.f32 %v270_v49, %v1198_v9  ;;  %v1285_v44 = vadd.f32 %v271_v12, %v1201_v21 }
  0x3a   :  { %v286_v1 = vmul.f32 %v240_v31, %v234_v62  ;;  %v287_v45 = vmul.f32 %v241_v55, %v235_v63  ;;  %v1288_v48 = vadd.f32 %v274_v53, %v1204_v58  ;;  %v1291_v5 = vadd.f32 %v275_v14, %v1207_v22 }
  0x3b   :  { %v290_v47 = vmul.f32 %v237_v43, %v237_v43  ;;  %v291_v10 = vmul.f32 %v238_v3, %v238_v3  ;;  %v1294_v9 = vadd.f32 %v278_v57, %v1210_v40  ;;  %v1297_v21 = vadd.f32 %v279_v18, %v1213_v20 }
  0x3c   :  { %v294_v62 = vmul.f32 %v240_v31, %v237_v43  ;;  %v295_v63 = vmul.f32 %v241_v55, %v238_v3  ;;  %v1300_v58 = vadd.f32 %v282_v61, %v1216_v13  ;;  %v1303_v22 = vadd.f32 %v283_v34, %v1219_v17  ;;  %v311_v43 = vld [vmem:[#allocation5 + $0x40] sm:$0xff]  ;;  %v312_v3 = vld [vmem:[#allocation5 + $0x48] sm:$0xff] }
  0x3d   :  { %v313_v36 = vmul.f32 %v299_v41, %v299_v41  ;;  %v314_v0 = vmul.f32 %v300_v35, %v300_v35  ;;  %v1306_v40 = vadd.f32 %v286_v1, %v1222_v25  ;;  %v1309_v20 = vadd.f32 %v287_v45, %v1225_v26 }
  0x3e   :  { %v317_v31 = vmul.f32 %v302_v38, %v299_v41  ;;  %v318_v55 = vmul.f32 %v303_v39, %v300_v35  ;;  %v1312_v13 = vadd.f32 %v290_v47, %v1228_v54  ;;  %v1315_v17 = vadd.f32 %v291_v10, %v1231_v30 }
  0x3f   :  { %v321_v2 = vmul.f32 %v305_v52, %v299_v41  ;;  %v322_v4 = vmul.f32 %v306_v15, %v300_v35  ;;  %v1318_v6 = vadd.f32 %v294_v62, %v1234_v56  ;;  %v1321_v25 = vadd.f32 %v295_v63, %v1237_v32  ;;  %v371_v63 = vld [vmem:[#allocation2 + $0x148] sm:$0xff] }
  0x40   :  { %v325_v26 = vmul.f32 %v308_v33, %v299_v41  ;;  %v326_v8 = vmul.f32 %v309_v19, %v300_v35  ;;  %v1324_v49 = vadd.f32 %v313_v36, %v1240_v60  ;;  %v1327_v12 = vadd.f32 %v314_v0, %v1243_v24 }
  0x41   :  { %v329_v54 = vmul.f32 %v311_v43, %v299_v41  ;;  %v330_v53 = vmul.f32 %v312_v3, %v300_v35  ;;  %v1330_v30 = vadd.f32 %v317_v31, %v1246_v37  ;;  %v1333_v14 = vadd.f32 %v318_v55, %v1249_v29  ;;  %v373_v31 = vld [vmem:[#allocation2 + $0x150] sm:$0xff]  ;;  %v374_v55 = vld [vmem:[#allocation2 + $0x158] sm:$0xff] }
  0x42   :  { %v333_v56 = vmul.f32 %v302_v38, %v302_v38  ;;  %v334_v57 = vmul.f32 %v303_v39, %v303_v39  ;;  %v1336_v32 = vadd.f32 %v321_v2, %v1252_v42  ;;  %v1339_v18 = vadd.f32 %v322_v4, %v1255_v46  ;;  %v1383_v2 = vld [vmem:[#allocation2 + $0x160] sm:$0xff]  ;;  %v1385_v4 = vld [vmem:[#allocation2 + $0x168] sm:$0xff] }
  0x43   :  { %v337_v60 = vmul.f32 %v305_v52, %v302_v38  ;;  %v338_v61 = vmul.f32 %v306_v15, %v303_v39  ;;  %v1342_v24 = vadd.f32 %v325_v26, %v1258_v7  ;;  %v1345_v34 = vadd.f32 %v326_v8, %v1261_v27  ;;  %v1393_v26 = vld [vmem:[#allocation2 + $0x170] sm:$0xff]  ;;  %v1395_v8 = vld [vmem:[#allocation2 + $0x178] sm:$0xff] }
  0x44   :  { %v341_v37 = vmul.f32 %v308_v33, %v302_v38  ;;  %v342_v1 = vmul.f32 %v309_v19, %v303_v39  ;;  %v1348_v29 = vadd.f32 %v329_v54, %v1264_v11  ;;  %v1351_v45 = vadd.f32 %v330_v53, %v1267_v50 }
  0x45   :  { %v345_v42 = vmul.f32 %v311_v43, %v302_v38  ;;  %v346_v41 = vmul.f32 %v312_v3, %v303_v39  ;;  %v1354_v46 = vadd.f32 %v333_v56, %v1270_v16  ;;  %v1357_v35 = vadd.f32 %v334_v57, %v1273_v51  ;;  %v370_v51 = vld [vmem:[#allocation2 + $0x140] sm:$0xff]  ;;  %v1413_v56 = vld [vmem:[#allocation5 + $0x50] sm:$0xff]  ;;  %v1415_v57 = vld [vmem:[#allocation5 + $0x58] sm:$0xff] }
  0x46   :  { %v349_v7 = vmul.f32 %v305_v52, %v305_v52  ;;  %v350_v47 = vmul.f32 %v306_v15, %v306_v15  ;;  %v1360_v27 = vadd.f32 %v337_v60, %v1276_v23  ;;  %v1363_v10 = vadd.f32 %v338_v61, %v1279_v59 }
  0x47   :  { %v353_v11 = vmul.f32 %v308_v33, %v305_v52  ;;  %v354_v62 = vmul.f32 %v309_v19, %v306_v15  ;;  %v1366_v50 = vadd.f32 %v341_v37, %v1282_v28  ;;  %v1369_v38 = vadd.f32 %v342_v1, %v1285_v44 }
  0x48   :  { %v357_v16 = vmul.f32 %v311_v43, %v305_v52  ;;  %v358_v39 = vmul.f32 %v312_v3, %v306_v15  ;;  %v1372_v36 = vadd.f32 %v345_v42, %v1288_v48  ;;  %v1375_v23 = vadd.f32 %v346_v41, %v1291_v5 }
  0x49   :  { %v361_v59 = vmul.f32 %v308_v33, %v308_v33  ;;  %v362_v0 = vmul.f32 %v309_v19, %v309_v19  ;;  %v1378_v28 = vadd.f32 %v349_v7, %v1294_v9  ;;  %v1381_v44 = vadd.f32 %v350_v47, %v1297_v21 }
  0x4a   :  { %v365_v52 = vmul.f32 %v311_v43, %v308_v33  ;;  %v366_v15 = vmul.f32 %v312_v3, %v309_v19  ;;  %v1388_v48 = vadd.f32 %v353_v11, %v1300_v58  ;;  %v1391_v5 = vadd.f32 %v354_v62, %v1303_v22  ;;  %v1403_v3 = vld [vmem:[#allocation2 + $0x180] sm:$0xff]  ;;  %v1405_v58 = vld [vmem:[#allocation2 + $0x188] sm:$0xff] }
  0x4b   :  { %v384_v9 = vmul.f32 %v370_v51, %v370_v51  ;;  %v385_v54 = vmul.f32 %v371_v63, %v371_v63  ;;  %v1398_v21 = vadd.f32 %v357_v16, %v1306_v40  ;;  %v1401_v33 = vadd.f32 %v358_v39, %v1309_v20  ;;  %v1441_v11 = vld [vmem:[#allocation2 + $0x1c0] sm:$0xff] }
  0x4c   :  { %v388_v19 = vmul.f32 %v373_v31, %v370_v51  ;;  %v389_v43 = vmul.f32 %v374_v55, %v371_v63  ;;  %v1408_v22 = vadd.f32 %v361_v59, %v1312_v13  ;;  %v1411_v53 = vadd.f32 %v362_v0, %v1315_v17 }
  0x4d   :  { %v392_v40 = vmul.f32 %v1383_v2, %v370_v51  ;;  %v393_v20 = vmul.f32 %v1385_v4, %v371_v63  ;;  %v1420_v60 = vadd.f32 %v365_v52, %v1318_v6  ;;  %v1423_v61 = vadd.f32 %v366_v15, %v1321_v25 }
  0x4e   :  { %v396_v13 = vmul.f32 %v1393_v26, %v370_v51  ;;  %v397_v37 = vmul.f32 %v1395_v8, %v371_v63  ;;  %v386_v17 = vadd.f32 %v384_v9, %v1324_v49  ;;  %v387_v1 = vadd.f32 %v385_v54, %v1327_v12  ;;  %v1443_v49 = vld [vmem:[#allocation2 + $0x1c8] sm:$0xff]  ;;  %v1471_v9 = vld [vmem:[#allocation2 + $0x200] sm:$0xff] }
  0x4f   :  { %v455_v42 = vmul.f32 %v1403_v3, %v1403_v3  ;;  %v456_v41 = vmul.f32 %v1405_v58, %v1405_v58  ;;  %v1434_v6 = vadd.f32 %v388_v19, %v1330_v30  ;;  %v1437_v25 = vadd.f32 %v389_v43, %v1333_v14  ;;  %v1473_v54 = vld [vmem:[#allocation2 + $0x208] sm:$0xff] }
  0x50   :  { %v400_v7 = vmul.f32 %v1413_v56, %v370_v51  ;;  %v401_v47 = vmul.f32 %v1415_v57, %v371_v63  ;;  %v1446_v12 = vadd.f32 %v392_v40, %v1336_v32  ;;  %v1449_v62 = vadd.f32 %v393_v20, %v1339_v18 }
  0x51   :  { %v404_v16 = vmul.f32 %v373_v31, %v373_v31  ;;  %v405_v30 = vmul.f32 %v374_v55, %v374_v55  ;;  %v1452_v39 = vadd.f32 %v396_v13, %v1342_v24  ;;  %v1455_v14 = vadd.f32 %v397_v37, %v1345_v34 }
  0x52   :  { %v408_v51 = vmul.f32 %v1383_v2, %v373_v31  ;;  %v409_v63 = vmul.f32 %v1385_v4, %v374_v55  ;;  %v457_v59 = vadd.f32 %v455_v42, %v386_v17  ;;  %v458_v0 = vadd.f32 %v456_v41, %v387_v1  ;;  %v1507_v41 = vld [vmem:[#allocation2 + $0x240] sm:$0xff] }
  0x53   :  { %v526_v32 = vmul.f32 %v1441_v11, %v1441_v11  ;;  %v527_v18 = vmul.f32 %v1443_v49, %v1443_v49  ;;  %v1464_v52 = vadd.f32 %v400_v7, %v1348_v29  ;;  %v1467_v24 = vadd.f32 %v401_v47, %v1351_v45  ;;  %v1509_v7 = vld [vmem:[#allocation2 + $0x248] sm:$0xff] }
  0x54   :  { %v412_v34 = vmul.f32 %v1393_v26, %v373_v31  ;;  %v413_v15 = vmul.f32 %v1395_v8, %v374_v55  ;;  %v1476_v19 = vadd.f32 %v404_v16, %v1354_v46  ;;  %v1479_v43 = vadd.f32 %v405_v30, %v1357_v35 }
  0x55   :  { %v416_v29 = vmul.f32 %v1413_v56, %v373_v31  ;;  %v417_v40 = vmul.f32 %v1415_v57, %v374_v55  ;;  %v1484_v45 = vadd.f32 %v408_v51, %v1360_v27  ;;  %v420_v20 = vmul.f32 %v1383_v2, %v1383_v2 }
  0x56   :  { %v421_v13 = vmul.f32 %v1385_v4, %v1385_v4  ;;  %v424_v46 = vmul.f32 %v1393_v26, %v1383_v2  ;;  %v528_v37 = vadd.f32 %v526_v32, %v457_v59  ;;  %v529_v17 = vadd.f32 %v527_v18, %v458_v0  ;;  %v1532_v59 = vld [vmem:[#allocation2 + $0x1a0] sm:$0xff]  ;;  %v1536_v0 = vld [vmem:[#allocation2 + $0x1b0] sm:$0xff] }
  0x57   :  { %v597_v35 = vmul.f32 %v1471_v9, %v1471_v9  ;;  %v598_v31 = vmul.f32 %v1473_v54, %v1473_v54  ;;  %v1497_v27 = vadd.f32 %v409_v63, %v1363_v10  ;;  %v1500_v55 = vadd.f32 %v412_v34, %v1366_v50 }
  0x58   :  { %v1503_v1 = vadd.f32 %v413_v15, %v1369_v38  ;;  %v425_v42 = vmul.f32 %v1395_v8, %v1385_v4  ;;  %v1512_v47 = vadd.f32 %v416_v29, %v1372_v36  ;;  %v1515_v16 = vadd.f32 %v417_v40, %v1375_v23  ;;  %v444_v38 = vld [vmem:[#allocation2 + $0x190] sm:$0xff]  ;;  %v445_v23 = vld [vmem:[#allocation2 + $0x198] sm:$0xff]  ;;  %v1550_v29 = vld [vmem:[#allocation5 + $0x60] sm:$0xff] }
  0x59   :  { %v428_v10 = vmul.f32 %v1413_v56, %v1383_v2  ;;  %v429_v50 = vmul.f32 %v1415_v57, %v1385_v4  ;;  %v1522_v30 = vadd.f32 %v420_v20, %v1378_v28  ;;  %v1525_v51 = vadd.f32 %v421_v13, %v1381_v44  ;;  %v1534_v2 = vld [vmem:[#allocation2 + $0x1a8] sm:$0xff]  ;;  %v1538_v4 = vld [vmem:[#allocation2 + $0x1b8] sm:$0xff] }
  0x5a   :  { %v1528_v63 = vadd.f32 %v424_v46, %v1388_v48  ;;  %v432_v36 = vmul.f32 %v1393_v26, %v1393_v26  ;;  %v599_v28 = vadd.f32 %v597_v35, %v528_v37  ;;  %v600_v32 = vadd.f32 %v598_v31, %v529_v17  ;;  %v1563_v17 = vld [vmem:[#allocation5 + $0x68] sm:$0xff] }
  0x5b   :  { %v668_v44 = vmul.f32 %v1507_v41, %v1507_v41  ;;  %v669_v48 = vmul.f32 %v1509_v7, %v1509_v7  ;;  %v433_v18 = vmul.f32 %v1395_v8, %v1395_v8  ;;  %v436_v34 = vmul.f32 %v1413_v56, %v1393_v26 }
  0x5c   :  { %v437_v15 = vmul.f32 %v1415_v57, %v1395_v8  ;;  %v459_v40 = vmul.f32 %v444_v38, %v1403_v3  ;;  %v1554_v20 = vadd.f32 %v425_v42, %v1391_v5  ;;  %v1557_v13 = vadd.f32 %v428_v10, %v1398_v21 }
  0x5d   :  { %v1560_v46 = vadd.f32 %v429_v50, %v1401_v33  ;;  %v460_v37 = vmul.f32 %v445_v23, %v1405_v58  ;;  %v463_v26 = vmul.f32 %v1532_v59, %v1403_v3  ;;  %v464_v8 = vmul.f32 %v1534_v2, %v1405_v58 }
  0x5e   :  { %v467_v5 = vmul.f32 %v1536_v0, %v1403_v3  ;;  %v468_v21 = vmul.f32 %v1538_v4, %v1405_v58  ;;  %v1574_v56 = vadd.f32 %v432_v36, %v1408_v22  ;;  %v471_v33 = vmul.f32 %v1550_v29, %v1403_v3 }
  0x5f   :  { %2179 = vst [vmem:[#allocation11_spill] sm:$0xff] %v1560_v46  ;;  %v670_v57 = vadd.f32 %v668_v44, %v599_v28  ;;  %v671_v35 = vadd.f32 %v669_v48, %v600_v32  ;;  %v1579_v31 = vadd.f32 %v433_v18, %v1411_v53  ;;  %v1582_v42 = vadd.f32 %v436_v34, %v1420_v60  ;;  %v1588_v46 = vld [vmem:[#allocation2 + $0x1d0] sm:$0xff]  ;;  %v1593_v32 = vld [vmem:[#allocation2 + $0x1d8] sm:$0xff] }
  0x60   :  { %v1585_v10 = vadd.f32 %v437_v15, %v1423_v61  ;;  %v461_v50 = vadd.f32 %v459_v40, %v1434_v6  ;;  %v462_v22 = vadd.f32 %v460_v37, %v1437_v25  ;;  %v472_v3 = vmul.f32 %v1563_v17, %v1405_v58  ;;  %v1617_v34 = vld [vmem:[#allocation2 + $0x210] sm:$0xff]  ;;  %v1622_v40 = vld [vmem:[#allocation2 + $0x218] sm:$0xff] }
  0x61   :  { %v475_v36 = vmul.f32 %v444_v38, %v444_v38  ;;  %v476_v28 = vmul.f32 %v445_v23, %v445_v23  ;;  %v1596_v53 = vadd.f32 %v463_v26, %v1446_v12  ;;  %v1599_v60 = vadd.f32 %v464_v8, %v1449_v62 }
  0x62   :  { %v1602_v61 = vadd.f32 %v467_v5, %v1452_v39  ;;  %v1605_v6 = vadd.f32 %v468_v21, %v1455_v14  ;;  %v1608_v25 = vadd.f32 %v471_v33, %v1464_v52  ;;  %v530_v58 = vmul.f32 %v1588_v46, %v1441_v11 }
  0x63   :  { %v724_v44 = vadd.f32 1e-12, %v670_v57  ;;  %v725_v48 = vadd.f32 1e-12, %v671_v35  ;;  %v479_v12 = vmul.f32 %v1532_v59, %v444_v38  ;;  %v480_v18 = vmul.f32 %v1534_v2, %v445_v23 }
  0x64   :  { %v483_v62 = vmul.f32 %v1536_v0, %v444_v38  ;;  %v531_v39 = vmul.f32 %v1593_v32, %v1443_v49  ;;  %v484_v14 = vmul.f32 %v1538_v4, %v445_v23  ;;  %v487_v52 = vmul.f32 %v1550_v29, %v444_v38 }
  0x65   :  { %v488_v15 = vmul.f32 %v1563_v17, %v445_v23  ;;  %940 = vrcp.f32 %v724_v44  ;;  %v1625_v37 = vadd.f32 %v472_v3, %v1467_v24  ;;  %v491_v26 = vmul.f32 %v1532_v59, %v1532_v59 }
  0x66   :  { %v492_v8 = vmul.f32 %v1534_v2, %v1534_v2  ;;  %942 = vrcp.f32 %v725_v48  ;;  %v477_v5 = vadd.f32 %v475_v36, %v1476_v19  ;;  %v478_v21 = vadd.f32 %v476_v28, %v1479_v43 }
  0x67   :  { %v532_v38 = vadd.f32 %v530_v58, %v461_v50  ;;  %v601_v23 = vmul.f32 %v1617_v34, %v1471_v9  ;;  %v1636_v33 = vadd.f32 %v479_v12, %v1484_v45  ;;  %v1639_v24 = vadd.f32 %v480_v18, %v1497_v27  ;;  %v1655_v45 = vld [vmem:[#allocation2 + $0x250] sm:$0xff]  ;;  %v1657_v27 = vld [vmem:[#allocation2 + $0x258] sm:$0xff] }
  0x68   :  { %v533_v57 = vadd.f32 %v531_v39, %v462_v22  ;;  %v602_v35 = vmul.f32 %v1622_v40, %v1473_v54  ;;  %v1644_v3 = vadd.f32 %v483_v62, %v1500_v55  ;;  %v1647_v19 = vadd.f32 %v484_v14, %v1503_v1 }
  0x69   :  { %v1650_v43 = vadd.f32 %v487_v52, %v1512_v47  ;;  %v1653_v50 = vadd.f32 %v488_v15, %v1515_v16  ;;  %v1660_v22 = vadd.f32 %v491_v26, %v1522_v30  ;;  %v1663_v36 = vadd.f32 %v492_v8, %v1525_v51 }
  0x6a   :  { %v495_v55 = vmul.f32 %v1536_v0, %v1532_v59  ;;  %v546_v1 = vmul.f32 %v1588_v46, %v1588_v46  ;;  %v496_v16 = vmul.f32 %v1538_v4, %v1534_v2  ;;  %v499_v28 = vmul.f32 %v1550_v29, %v1532_v59 }
  0x6b   :  { %2180 = vst [vmem:[#allocation12_spill] sm:$0xff] %v1660_v22  ;;  %v941_v47 = vpop.eup %940  ;;  %v547_v30 = vmul.f32 %v1593_v32, %v1593_v32  ;;  %v603_v58 = vadd.f32 %v601_v23, %v532_v38  ;;  %v604_v51 = vadd.f32 %v602_v35, %v533_v57  ;;  %v672_v18 = vmul.f32 %v1655_v45, %v1507_v41  ;;  %v1689_v57 = vld [vmem:[#allocation2 + $0x1e0] sm:$0xff] }
  0x6c   :  { %2181 = vst [vmem:[#allocation13_spill] sm:$0xff] %v1663_v36  ;;  %v943_v12 = vpop.eup %942  ;;  %v673_v62 = vmul.f32 %v1657_v27, %v1509_v7  ;;  %v728_v39 = vmul.f32 %v941_v47, %v724_v44  ;;  %v500_v14 = vmul.f32 %v1563_v17, %v1534_v2  ;;  %v503_v52 = vmul.f32 %v1536_v0, %v1536_v0  ;;  %v1691_v44 = vld [vmem:[#allocation2 + $0x1e8] sm:$0xff] }
  0x6d   :  { %v504_v59 = vmul.f32 %v1538_v4, %v1538_v4  ;;  %v729_v15 = vmul.f32 %v943_v12, %v725_v48  ;;  %v507_v26 = vmul.f32 %v1550_v29, %v1536_v0  ;;  %v508_v8 = vmul.f32 %v1563_v17, %v1538_v4  ;;  %v1700_v0 = vld [vmem:[#allocation2 + $0x1f0] sm:$0xff]  ;;  %v1702_v4 = vld [vmem:[#allocation2 + $0x1f8] sm:$0xff] }
  0x6e   :  { %v548_v38 = vadd.f32 %v546_v1, %v477_v5  ;;  %v730_v23 = vsub.f32 2.0, %v728_v39  ;;  %v549_v2 = vadd.f32 %v547_v30, %v478_v21  ;;  %v617_v35 = vmul.f32 %v1617_v34, %v1617_v34  ;;  %v2182_v30 = vld [vmem:[#allocation11_spill] sm:$0xff] }
  0x6f   :  { %v618_v36 = vmul.f32 %v1622_v40, %v1622_v40  ;;  %v731_v48 = vsub.f32 2.0, %v729_v15  ;;  %v1698_v22 = vadd.f32 %v495_v55, %v1528_v63  ;;  %v1704_v29 = vadd.f32 %v672_v18, %v603_v58  ;;  %v1741_v18 = vld [vmem:[#allocation2 + $0x228] sm:$0xff] }
  0x70   :  { %v1706_v17 = vadd.f32 %v673_v62, %v604_v51  ;;  %v1708_v5 = vmul.f32 %v941_v47, %v730_v23  ;;  %v1711_v21 = vadd.f32 %v496_v16, %v1554_v20  ;;  %v1714_v1 = vadd.f32 %v499_v28, %v1557_v13  ;;  %v1727_v51 = vld [vmem:[#allocation5 + $0x70] sm:$0xff]  ;;  %v1729_v47 = vld [vmem:[#allocation5 + $0x78] sm:$0xff] }
  0x71   :  { %v1717_v39 = vadd.f32 %v500_v14, %v2182_v30  ;;  %v1719_v63 = vmul.f32 %v943_v12, %v731_v48  ;;  %v1722_v55 = vadd.f32 %v503_v52, %v1574_v56  ;;  %v1725_v58 = vadd.f32 %v504_v59, %v1579_v31  ;;  %v1739_v31 = vld [vmem:[#allocation2 + $0x220] sm:$0xff] }
  0x72   :  { %v534_v20 = vmul.f32 %v1689_v57, %v1441_v11  ;;  %v535_v13 = vmul.f32 %v1691_v44, %v1443_v49  ;;  %v538_v16 = vmul.f32 %v1700_v0, %v1441_v11  ;;  %v539_v56 = vmul.f32 %v1702_v4, %v1443_v49 }
  0x73   :  { %v619_v28 = vadd.f32 %v617_v35, %v548_v38  ;;  %v620_v12 = vadd.f32 %v618_v36, %v549_v2  ;;  %v688_v62 = vmul.f32 %v1655_v45, %v1655_v45  ;;  %v689_v14 = vmul.f32 %v1657_v27, %v1657_v27 }
  0x74   :  { %v1749_v52 = vmul.f32 %v1708_v5, %v1704_v29  ;;  %v1753_v59 = vmul.f32 %v1719_v63, %v1706_v17  ;;  %v1756_v36 = vadd.f32 %v507_v26, %v1582_v42  ;;  %v1759_v15 = vadd.f32 %v508_v8, %v1585_v10 }
  0x75   :  { %v542_v38 = vmul.f32 %v1727_v51, %v1441_v11  ;;  %v543_v23 = vmul.f32 %v1729_v47, %v1443_v49  ;;  %v536_v2 = vadd.f32 %v534_v20, %v1596_v53  ;;  %v537_v35 = vadd.f32 %v535_v13, %v1599_v60  ;;  %v1781_v53 = vld [vmem:[#allocation2 + $0x260] sm:$0xff] }
  0x76   :  { %2183 = vst [vmem:[#allocation11_spill] sm:$0xff] %v1749_v52  ;;  %v550_v48 = vmul.f32 %v1689_v57, %v1588_v46  ;;  %v551_v42 = vmul.f32 %v1691_v44, %v1593_v32  ;;  %v1772_v26 = vadd.f32 %v538_v16, %v1602_v61  ;;  %v1775_v10 = vadd.f32 %v539_v56, %v1605_v6  ;;  %v1797_v56 = vld [vmem:[#allocation2 + $0x268] sm:$0xff] }
  0x77   :  { %2184 = vst [vmem:[#allocation14_spill] sm:$0xff] %v1753_v59  ;;  %v605_v11 = vmul.f32 %v1739_v31, %v1471_v9  ;;  %v606_v49 = vmul.f32 %v1741_v18, %v1473_v54  ;;  %v690_v60 = vadd.f32 %v688_v62, %v619_v28  ;;  %v691_v8 = vadd.f32 %v689_v14, %v620_v12 }
  0x78   :  { %2185 = vst [vmem:[#allocation15_spill] sm:$0xff] %v1781_v53  ;;  %v742_v30 = vmul.f32 %v1749_v52, %v1704_v29  ;;  %v743_v61 = vmul.f32 %v1753_v59, %v1706_v17  ;;  %v1788_v20 = vadd.f32 %v542_v38, %v1608_v25  ;;  %v1791_v6 = vadd.f32 %v543_v23, %v1625_v37 }
  0x79   :  { %v554_v13 = vmul.f32 %v1700_v0, %v1588_v46  ;;  %v555_v16 = vmul.f32 %v1702_v4, %v1593_v32  ;;  %2187 = vst [vmem:[#allocation17_spill] sm:$0xff] %v1797_v56  ;;  %v552_v28 = vadd.f32 %v550_v48, %v1636_v33  ;;  %v553_v12 = vadd.f32 %v551_v42, %v1639_v24 }
  0x7a   :  { %2186 = vst [vmem:[#allocation16_spill] sm:$0xff] %v1791_v6  ;;  %v558_v62 = vmul.f32 %v1727_v51, %v1588_v46  ;;  %v559_v25 = vmul.f32 %v1729_v47, %v1593_v32  ;;  %v562_v37 = vmul.f32 %v1689_v57, %v1689_v57  ;;  %v563_v14 = vmul.f32 %v1691_v44, %v1691_v44 }
  0x7b   :  { %v607_v38 = vadd.f32 %v605_v11, %v536_v2  ;;  %v676_v23 = vmul.f32 %v1781_v53, %v1507_v41  ;;  %v608_v6 = vadd.f32 %v606_v49, %v537_v35  ;;  %v677_v33 = vmul.f32 %v1797_v56, %v1509_v7 }
  0x7c   :  { %v744_v24 = vsub.f32 %v690_v60, %v742_v30  ;;  %v745_v48 = vsub.f32 %v691_v8, %v743_v61  ;;  %v1814_v46 = vadd.f32 %v554_v13, %v1644_v3  ;;  %v1817_v32 = vadd.f32 %v555_v16, %v1647_v19  ;;  %v2188_v19 = vld [vmem:[#allocation12_spill] sm:$0xff]  ;;  %v2189_v8 = vld [vmem:[#allocation13_spill] sm:$0xff] }
  0x7d   :  { %v566_v42 = vmul.f32 %v1700_v0, %v1689_v57  ;;  %v567_v2 = vmul.f32 %v1702_v4, %v1691_v44  ;;  %v1824_v11 = vadd.f32 %v558_v62, %v1650_v43  ;;  %v1827_v35 = vadd.f32 %v559_v25, %v1653_v50 }
  0x7e   :  { %v570_v49 = vmul.f32 %v1727_v51, %v1689_v57  ;;  %v571_v3 = vmul.f32 %v1729_v47, %v1691_v44  ;;  %v564_v60 = vadd.f32 %v562_v37, %v2188_v19  ;;  %v565_v30 = vadd.f32 %v563_v14, %v2189_v8 }
  0x7f   :  { %v621_v61 = vmul.f32 %v1739_v31, %v1617_v34  ;;  %v1837_v13 = vadd.f32 %v676_v23, %v607_v38  ;;  %v622_v43 = vmul.f32 %v1741_v18, %v1622_v40  ;;  %v1841_v50 = vadd.f32 %v677_v33, %v608_v6  ;;  %v1855_v38 = vld [vmem:[#allocation2 + $0x230] sm:$0xff]  ;;  %v1857_v6 = vld [vmem:[#allocation2 + $0x238] sm:$0xff]  ;;  %v1863_v23 = vld [vmem:[#allocation5 + $0x80] sm:$0xff] }
  0x80   :  { %v790_v16 = vadd.f32 1e-12, %v744_v24  ;;  %v791_v62 = vadd.f32 1e-12, %v745_v48  ;;  %v1844_v57 = vadd.f32 %v566_v42, %v1698_v22  ;;  %v1847_v44 = vadd.f32 %v567_v2, %v1711_v21 }
  0x81   :  { %v574_v25 = vmul.f32 %v1700_v0, %v1700_v0  ;;  %v575_v37 = vmul.f32 %v1702_v4, %v1702_v4  ;;  %v578_v14 = vmul.f32 %v1727_v51, %v1700_v0  ;;  %v633_v22 = vmul.f32 %v1739_v31, %v1739_v31 }
  0x82   :  { %v634_v21 = vmul.f32 %v1741_v18, %v1741_v18  ;;  %944 = vrcp.f32 %v790_v16  ;;  %v623_v33 = vadd.f32 %v621_v61, %v552_v28  ;;  %v692_v24 = vmul.f32 %v1781_v53, %v1655_v45 }
  0x83   :  { %v1869_v0 = vmul.f32 %v1708_v5, %v1837_v13  ;;  %946 = vrcp.f32 %v791_v62  ;;  %v1872_v51 = vadd.f32 %v570_v49, %v1714_v1  ;;  %v624_v48 = vadd.f32 %v622_v43, %v553_v12  ;;  %v1902_v43 = vld [vmem:[#allocation2 + $0x278] sm:$0xff] }
  0x84   :  { %v693_v42 = vmul.f32 %v1797_v56, %v1657_v27  ;;  %v1878_v2 = vmul.f32 %v1719_v63, %v1841_v50  ;;  %v1881_v28 = vadd.f32 %v571_v3, %v1717_v39  ;;  %v579_v19 = vmul.f32 %v1729_v47, %v1702_v4  ;;  %v1900_v47 = vld [vmem:[#allocation2 + $0x270] sm:$0xff] }
  0x85   :  { %2190 = vst [vmem:[#allocation12_spill] sm:$0xff] %v1869_v0  ;;  %v609_v8 = vmul.f32 %v1855_v38, %v1471_v9  ;;  %v610_v1 = vmul.f32 %v1857_v6, %v1473_v54  ;;  %v1890_v12 = vadd.f32 %v574_v25, %v1722_v55  ;;  %v1893_v49 = vadd.f32 %v575_v37, %v1725_v58 }
  0x86   :  { %2191 = vst [vmem:[#allocation13_spill] sm:$0xff] %v1872_v51  ;;  %v1896_v61 = vadd.f32 %v578_v14, %v1756_v36  ;;  %v613_v39 = vmul.f32 %v1863_v23, %v1471_v9  ;;  %v635_v3 = vadd.f32 %v633_v22, %v564_v60  ;;  %v636_v4 = vadd.f32 %v634_v21, %v565_v30 }
  0x87   :  { %2192 = vst [vmem:[#allocation18_spill] sm:$0xff] %v1878_v2  ;;  %v746_v55 = vmul.f32 %v1869_v0, %v1704_v29  ;;  %v704_v58 = vmul.f32 %v1781_v53, %v1781_v53  ;;  %v705_v36 = vmul.f32 %v1797_v56, %v1797_v56  ;;  %v747_v9 = vmul.f32 %v1878_v2, %v1706_v17 }
  0x88   :  { %2193 = vst [vmem:[#allocation19_spill] sm:$0xff] %v1881_v28  ;;  %v694_v28 = vadd.f32 %v692_v24, %v623_v33  ;;  %v945_v25 = vpop.eup %944  ;;  %v611_v30 = vadd.f32 %v609_v8, %v1772_v26  ;;  %v612_v37 = vadd.f32 %v610_v1, %v1775_v10  ;;  %v758_v14 = vmul.f32 %v1749_v52, %v1837_v13  ;;  %v1926_v1 = vld [vmem:[#allocation5 + $0x88] sm:$0xff] }
  0x89   :  { %2194 = vst [vmem:[#allocation20_spill] sm:$0xff] %v1890_v12  ;;  %v695_v12 = vadd.f32 %v693_v42, %v624_v48  ;;  %v947_v60 = vpop.eup %946  ;;  %v794_v22 = vmul.f32 %v945_v25, %v790_v16  ;;  %v680_v21 = vmul.f32 %v1900_v47, %v1507_v41  ;;  %v681_v33 = vmul.f32 %v1902_v43, %v1509_v7 }
  0x8a   :  { %2195 = vst [vmem:[#allocation21_spill] sm:$0xff] %v1893_v49  ;;  %v759_v24 = vmul.f32 %v1753_v59, %v1841_v50  ;;  %v795_v48 = vmul.f32 %v947_v60, %v791_v62  ;;  %v625_v42 = vmul.f32 %v1855_v38, %v1617_v34  ;;  %v626_v26 = vmul.f32 %v1857_v6, %v1622_v40 }
  0x8b   :  { %2196 = vst [vmem:[#allocation22_spill] sm:$0xff] %v1896_v61  ;;  %v748_v10 = vsub.f32 %v694_v28, %v746_v55  ;;  %v796_v8 = vsub.f32 2.0, %v794_v22  ;;  %v706_v16 = vadd.f32 %v704_v58, %v635_v3  ;;  %v707_v61 = vadd.f32 %v705_v36, %v636_v4 }
  0x8c   :  { %v749_v52 = vsub.f32 %v695_v12, %v747_v9  ;;  %v797_v49 = vsub.f32 2.0, %v795_v48  ;;  %v1928_v56 = vsub.f32 %v694_v28, %v758_v14  ;;  %v762_v59 = vmul.f32 %v1869_v0, %v1837_v13 }
  0x8d   :  { %v763_v62 = vmul.f32 %v1878_v2, %v1841_v50  ;;  %v1934_v51 = vmul.f32 %v945_v25, %v796_v8  ;;  %v1936_v53 = vadd.f32 %v680_v21, %v611_v30  ;;  %v1938_v55 = vadd.f32 %v681_v33, %v612_v37 }
  0x8e   :  { %v1940_v22 = vsub.f32 %v695_v12, %v759_v24  ;;  %v1942_v3 = vmul.f32 %v947_v60, %v797_v49  ;;  %v1945_v4 = vadd.f32 %v579_v19, %v1759_v15  ;;  %v614_v28 = vmul.f32 %v1926_v1, %v1473_v54  ;;  %v1957_v49 = vld [vmem:[#allocation5 + $0x90] sm:$0xff]  ;;  %v1962_v19 = vld [vmem:[#allocation5 + $0x98] sm:$0xff] }
  0x8f   :  { %v629_v58 = vmul.f32 %v1863_v23, %v1617_v34  ;;  %v1952_v25 = vmul.f32 %v1934_v51, %v748_v10  ;;  %v615_v36 = vadd.f32 %v613_v39, %v1788_v20  ;;  %v627_v9 = vadd.f32 %v625_v42, %v1814_v46  ;;  %v2197_v39 = vld [vmem:[#allocation16_spill] sm:$0xff] }
  0x90   :  { %v628_v12 = vadd.f32 %v626_v26, %v1817_v32  ;;  %v1960_v15 = vmul.f32 %v1942_v3, %v749_v52  ;;  %v696_v54 = vmul.f32 %v1900_v47, %v1655_v45  ;;  %v764_v34 = vsub.f32 %v706_v16, %v762_v59 }
  0x91   :  { %v765_v60 = vsub.f32 %v707_v61, %v763_v62  ;;  %v818_v30 = vmul.f32 %v1952_v25, %v1928_v56  ;;  %v697_v20 = vmul.f32 %v1902_v43, %v1657_v27  ;;  %v1972_v46 = vmul.f32 %v1708_v5, %v1936_v53 }
  0x92   :  { %v1976_v52 = vmul.f32 %v1719_v63, %v1938_v55  ;;  %v819_v32 = vmul.f32 %v1960_v15, %v1940_v22  ;;  %v616_v59 = vadd.f32 %v614_v28, %v2197_v39  ;;  %v630_v61 = vmul.f32 %v1926_v1, %v1622_v40  ;;  %v2201_v39 = vld [vmem:[#allocation19_spill] sm:$0xff] }
  0x93   :  { %v631_v37 = vadd.f32 %v629_v58, %v1824_v11  ;;  %v684_v14 = vmul.f32 %v1957_v49, %v1507_v41  ;;  %v637_v21 = vmul.f32 %v1855_v38, %v1739_v31  ;;  %v638_v33 = vmul.f32 %v1857_v6, %v1741_v18 }
  0x94   :  { %v641_v24 = vmul.f32 %v1863_v23, %v1739_v31  ;;  %v685_v48 = vmul.f32 %v1962_v19, %v1509_v7  ;;  %v642_v40 = vmul.f32 %v1926_v1, %v1741_v18  ;;  %v645_v11 = vmul.f32 %v1855_v38, %v1855_v38 }
  0x95   :  { %v820_v42 = vsub.f32 %v764_v34, %v818_v30  ;;  %v821_v41 = vsub.f32 %v765_v60, %v819_v32  ;;  %v698_v26 = vadd.f32 %v696_v54, %v627_v9  ;;  %v699_v10 = vadd.f32 %v697_v20, %v628_v12  ;;  %v2198_v12 = vld [vmem:[#allocation15_spill] sm:$0xff]  ;;  %v2199_v34 = vld [vmem:[#allocation13_spill] sm:$0xff] }
  0x96   :  { %v750_v8 = vmul.f32 %v1972_v46, %v1704_v29  ;;  %v751_v16 = vmul.f32 %v1976_v52, %v1706_v17  ;;  %v632_v31 = vadd.f32 %v630_v61, %v1827_v35  ;;  %v646_v7 = vmul.f32 %v1857_v6, %v1857_v6  ;;  %v2200_v30 = vld [vmem:[#allocation17_spill] sm:$0xff] }
  0x97   :  { %v2007_v18 = vmul.f32 %v1863_v23, %v1855_v38  ;;  %v686_v62 = vadd.f32 %v684_v14, %v615_v36  ;;  %v639_v28 = vadd.f32 %v637_v21, %v1844_v57  ;;  %v640_v58 = vadd.f32 %v638_v33, %v1847_v44  ;;  %v2202_v38 = vld [vmem:[#allocation20_spill] sm:$0xff] }
  0x98   :  { %v687_v9 = vadd.f32 %v685_v48, %v616_v59  ;;  %v708_v54 = vmul.f32 %v1900_v47, %v2198_v12  ;;  %v643_v60 = vadd.f32 %v641_v24, %v2199_v34  ;;  %v709_v35 = vmul.f32 %v1902_v43, %v2200_v30  ;;  %v2203_v48 = vld [vmem:[#allocation21_spill] sm:$0xff] }
  0x99   :  { %v842_v20 = vadd.f32 1e-12, %v820_v42  ;;  %v843_v32 = vadd.f32 1e-12, %v821_v41  ;;  %v644_v61 = vadd.f32 %v642_v40, %v2201_v39  ;;  %v647_v23 = vadd.f32 %v645_v11, %v2202_v38  ;;  %v2205_v41 = vld [vmem:[#allocation14_spill] sm:$0xff] }
  0x9a   :  { %v752_v36 = vsub.f32 %v698_v26, %v750_v8  ;;  %v753_v14 = vsub.f32 %v699_v10, %v751_v16  ;;  %v700_v57 = vmul.f32 %v1957_v49, %v1655_v45  ;;  %v701_v44 = vmul.f32 %v1962_v19, %v1657_v27  ;;  %v2204_v27 = vld [vmem:[#allocation11_spill] sm:$0xff] }
  0x9b   :  { %v2023_v59 = vmul.f32 %v1708_v5, %v686_v62  ;;  %948 = vrcp.f32 %v842_v20  ;;  %v710_v21 = vadd.f32 %v708_v54, %v639_v28  ;;  %v2026_v33 = vmul.f32 %v1719_v63, %v687_v9 }
  0x9c   :  { %v766_v24 = vmul.f32 %v1972_v46, %v1837_v13  ;;  %950 = vrcp.f32 %v843_v32  ;;  %v648_v40 = vadd.f32 %v646_v7, %v2203_v48  ;;  %v711_v11 = vadd.f32 %v709_v35, %v640_v58 }
  0x9d   :  { %v767_v45 = vmul.f32 %v1976_v52, %v1841_v50  ;;  %v774_v42 = vmul.f32 %v2204_v27, %v1936_v53  ;;  %v712_v5 = vmul.f32 %v1957_v49, %v2198_v12  ;;  %v775_v63 = vmul.f32 %v2205_v41, %v1938_v55 }
  0x9e   :  { %v2040_v8 = vmul.f32 %v1934_v51, %v752_v36  ;;  %v2043_v16 = vmul.f32 %v1942_v3, %v753_v14  ;;  %v702_v7 = vadd.f32 %v700_v57, %v631_v37  ;;  %v716_v62 = vmul.f32 %v1900_v47, %v1900_v47 }
  0x9f   :  { %v717_v28 = vmul.f32 %v1902_v43, %v1902_v43  ;;  %v754_v58 = vmul.f32 %v2023_v59, %v1704_v29  ;;  %v703_v9 = vadd.f32 %v701_v44, %v632_v31  ;;  %v713_v12 = vmul.f32 %v1962_v19, %v2200_v30 }
  0xa0   :  { %v755_v54 = vmul.f32 %v2026_v33, %v1706_v17  ;;  %v768_v34 = vsub.f32 %v710_v21, %v766_v24  ;;  %v769_v39 = vsub.f32 %v711_v11, %v767_v45  ;;  %v2055_v37 = vsub.f32 %v698_v26, %v774_v42 }
  0xa1   :  { %v949_v35 = vpop.eup %948  ;;  %v778_v38 = vmul.f32 %v1869_v0, %v1936_v53  ;;  %v779_v36 = vmul.f32 %v1878_v2, %v1938_v55  ;;  %v2061_v29 = vsub.f32 %v699_v10, %v775_v63  ;;  %v822_v31 = vmul.f32 %v2040_v8, %v1928_v56 }
  0xa2   :  { %v951_v14 = vpop.eup %950  ;;  %v823_v17 = vmul.f32 %v2043_v16, %v1940_v22  ;;  %v846_v30 = vmul.f32 %v949_v35, %v842_v20  ;;  %v718_v57 = vadd.f32 %v716_v62, %v647_v23  ;;  %v719_v44 = vadd.f32 %v717_v28, %v648_v40 }
  0xa3   :  { %v756_v26 = vsub.f32 %v702_v7, %v754_v58  ;;  %v847_v24 = vmul.f32 %v951_v14, %v843_v32  ;;  %v757_v48 = vsub.f32 %v703_v9, %v755_v54  ;;  %v782_v45 = vmul.f32 %v1972_v46, %v1936_v53 }
  0xa4   :  { %v783_v42 = vmul.f32 %v1976_v52, %v1938_v55  ;;  %v848_v10 = vsub.f32 2.0, %v846_v30  ;;  %v780_v63 = vsub.f32 %v710_v21, %v778_v38  ;;  %v781_v2 = vsub.f32 %v711_v11, %v779_v36 }
  0xa5   :  { %v830_v0 = vmul.f32 %v1952_v25, %v2055_v37  ;;  %v849_v41 = vsub.f32 2.0, %v847_v24  ;;  %v824_v27 = vsub.f32 %v768_v34, %v822_v31  ;;  %v825_v20 = vsub.f32 %v769_v39, %v823_v17 }
  0xa6   :  { %v831_v23 = vmul.f32 %v1960_v15, %v2061_v29  ;;  %v850_v32 = vmul.f32 %v949_v35, %v848_v10  ;;  %v650_v40 = vmul.f32 %v1926_v1, %v1857_v6  ;;  %v714_v7 = vadd.f32 %v712_v5, %v643_v60 }
  0xa7   :  { %v715_v62 = vadd.f32 %v713_v12, %v644_v61  ;;  %v851_v28 = vmul.f32 %v951_v14, %v849_v41  ;;  %v784_v58 = vsub.f32 %v718_v57, %v782_v45  ;;  %v785_v9 = vsub.f32 %v719_v44, %v783_v42  ;;  %v2206_v41 = vld [vmem:[#allocation22_spill] sm:$0xff]  ;;  %v2207_v57 = vld [vmem:[#allocation11_spill] sm:$0xff] }
  0xa8   :  { %v834_v21 = vmul.f32 %v2040_v8, %v2055_v37  ;;  %v835_v11 = vmul.f32 %v2043_v16, %v2061_v29  ;;  %v770_v54 = vmul.f32 %v2023_v59, %v1837_v13  ;;  %v771_v34 = vmul.f32 %v2026_v33, %v1841_v50 }
  0xa9   :  { %v2086_v35 = vmul.f32 %v1934_v51, %v756_v26  ;;  %v2089_v6 = vmul.f32 %v1942_v3, %v757_v48  ;;  %v832_v1 = vsub.f32 %v780_v63, %v830_v0  ;;  %v833_v60 = vsub.f32 %v781_v2, %v831_v23  ;;  %v2208_v26 = vld [vmem:[#allocation14_spill] sm:$0xff] }
  0xaa   :  { %v2091_v61 = vmul.f32 %v850_v32, %v824_v27  ;;  %v2093_v5 = vmul.f32 %v851_v28, %v825_v20  ;;  %v651_v12 = vadd.f32 %v2007_v18, %v2206_v41  ;;  %v720_v13 = vmul.f32 %v1957_v49, %v1900_v47  ;;  %v2209_v20 = vld [vmem:[#allocation12_spill] sm:$0xff] }
  0xab   :  { %v836_v39 = vsub.f32 %v784_v58, %v834_v21  ;;  %v837_v50 = vsub.f32 %v785_v9, %v835_v11  ;;  %v652_v51 = vadd.f32 %v650_v40, %v1945_v4  ;;  %v721_v3 = vmul.f32 %v1962_v19, %v1902_v43 }
  0xac   :  { %v772_v38 = vsub.f32 %v714_v7, %v770_v54  ;;  %v826_v0 = vmul.f32 %v2086_v35, %v1928_v56  ;;  %v773_v2 = vsub.f32 %v715_v62, %v771_v34  ;;  %v827_v27 = vmul.f32 %v2089_v6, %v1940_v22 }
  0xad   :  { %v872_v18 = vmul.f32 %v2091_v61, %v832_v1  ;;  %v873_v36 = vmul.f32 %v2093_v5, %v833_v60  ;;  %v722_v47 = vadd.f32 %v720_v13, %v651_v12  ;;  %v786_v49 = vmul.f32 %v2023_v59, %v1936_v53 }
  0xae   :  { %v723_v31 = vadd.f32 %v721_v3, %v652_v51  ;;  %v787_v43 = vmul.f32 %v2026_v33, %v1938_v55  ;;  %v828_v19 = vsub.f32 %v772_v38, %v826_v0  ;;  %v829_v56 = vsub.f32 %v773_v2, %v827_v27 }
  0xaf   :  { %v874_v4 = vsub.f32 %v836_v39, %v872_v18  ;;  %v875_v14 = vsub.f32 %v837_v50, %v873_v36  ;;  %v806_v22 = vmul.f32 %v1952_v25, %v2207_v57  ;;  %v788_v44 = vsub.f32 %v722_v47, %v786_v49 }
  0xb0   :  { %v807_v24 = vmul.f32 %v1960_v15, %v2208_v26  ;;  %v789_v48 = vsub.f32 %v723_v31, %v787_v43  ;;  %v838_v53 = vmul.f32 %v2086_v35, %v2055_v37  ;;  %v2118_v45 = vmul.f32 %v850_v32, %v828_v19  ;;  %v2210_v37 = vld [vmem:[#allocation18_spill] sm:$0xff] }
  0xb1   :  { %v880_v17 = vadd.f32 1e-12, %v874_v4  ;;  %v881_v30 = vadd.f32 1e-12, %v875_v14  ;;  %v810_v55 = vmul.f32 %v2040_v8, %v2207_v57  ;;  %v814_v42 = vmul.f32 %v2086_v35, %v2207_v57 }
  0xb2   :  { %v839_v10 = vmul.f32 %v2089_v6, %v2061_v29  ;;  %v2126_v63 = vmul.f32 %v851_v28, %v829_v56  ;;  %v808_v23 = vsub.f32 %v2209_v20, %v806_v22  ;;  %v811_v40 = vmul.f32 %v2043_v16, %v2208_v26 }
  0xb3   :  { %952 = vrcp.f32 %v880_v17  ;;  %v809_v32 = vsub.f32 %v2210_v37, %v807_v24  ;;  %v815_v7 = vmul.f32 %v2089_v6, %v2208_v26  ;;  %v840_v62 = vsub.f32 %v788_v44, %v838_v53 }
  0xb4   :  { %954 = vrcp.f32 %v881_v30  ;;  %v876_v58 = vmul.f32 %v2118_v45, %v832_v1  ;;  %v812_v21 = vsub.f32 %v1972_v46, %v810_v55  ;;  %v816_v29 = vsub.f32 %v2023_v59, %v814_v42 }
  0xb5   :  { %v841_v28 = vsub.f32 %v789_v48, %v839_v10  ;;  %v877_v11 = vmul.f32 %v2126_v63, %v833_v60  ;;  %v813_v34 = vsub.f32 %v1976_v52, %v811_v40  ;;  %v856_v41 = vmul.f32 %v2091_v61, %v808_v23 }
  0xb6   :  { %v864_v12 = vmul.f32 %v2091_v61, %v1952_v25  ;;  %v817_v39 = vsub.f32 %v2026_v33, %v815_v7  ;;  %v857_v1 = vmul.f32 %v2093_v5, %v809_v32  ;;  %v865_v46 = vmul.f32 %v2093_v5, %v1960_v15 }
  0xb7   :  { %v860_v50 = vmul.f32 %v2118_v45, %v808_v23  ;;  %v868_v60 = vmul.f32 %v2118_v45, %v1952_v25  ;;  %v878_v52 = vsub.f32 %v840_v62, %v876_v58  ;;  %v861_v3 = vmul.f32 %v2126_v63, %v809_v32 }
  0xb8   :  { %v869_v38 = vmul.f32 %v2126_v63, %v1960_v15  ;;  %v879_v0 = vsub.f32 %v841_v28, %v877_v11  ;;  %v858_v2 = vsub.f32 %v812_v21, %v856_v41  ;;  %v866_v27 = vsub.f32 %v2040_v8, %v864_v12 }
  0xb9   :  { %v953_v9 = vpop.eup %952  ;;  %v859_v36 = vsub.f32 %v813_v34, %v857_v1  ;;  %v867_v47 = vsub.f32 %v2043_v16, %v865_v46  ;;  %v862_v4 = vsub.f32 %v816_v29, %v860_v50  ;;  %v870_v25 = vsub.f32 %v2086_v35, %v868_v60 }
  0xba   :  { %v955_v54 = vpop.eup %954  ;;  %v884_v13 = vmul.f32 %v953_v9, %v880_v17  ;;  %v863_v31 = vsub.f32 %v817_v39, %v861_v3  ;;  %v871_v43 = vsub.f32 %v2089_v6, %v869_v38 }
  0xbb   :  { %v885_v59 = vmul.f32 %v955_v54, %v881_v30 }
  0xbc   :  { %v886_v51 = vsub.f32 2.0, %v884_v13 }
  0xbd   :  { %v887_v33 = vsub.f32 2.0, %v885_v59 }
  0xbe   :  { %v888_v18 = vmul.f32 %v953_v9, %v886_v51 }
  0xbf   :  { %v889_v49 = vmul.f32 %v955_v54, %v887_v33 }
  0xc0   :  { %v890_v14 = vmul.f32 %v888_v18, %v878_v52 }
  0xc1   :  { %v891_v19 = vmul.f32 %v889_v49, %v879_v0 }
  0xc2   :  { %v892_v56 = vmul.f32 %v890_v14, %v858_v2  ;;  %v896_v15 = vmul.f32 %v890_v14, %v866_v27  ;;  %v900_v17 = vmul.f32 %v890_v14, %v2091_v61  ;;  %913 = vst [vmem:[#allocation7 + $0x30] sm:$0xff] %v890_v14 }
  0xc3   :  { %v893_v30 = vmul.f32 %v891_v19, %v859_v36  ;;  %v897_v8 = vmul.f32 %v891_v19, %v867_v47  ;;  %v901_v57 = vmul.f32 %v891_v19, %v2093_v5  ;;  %914 = vst [vmem:[#allocation7 + $0x38] sm:$0xff] %v891_v19 }
  0xc4   :  { %v894_v16 = vsub.f32 %v862_v4, %v892_v56  ;;  %v898_v22 = vsub.f32 %v870_v25, %v896_v15  ;;  %v902_v35 = vsub.f32 %v2118_v45, %v900_v17 }
  0xc5   :  { %v895_v44 = vsub.f32 %v863_v31, %v893_v30  ;;  %v899_v26 = vsub.f32 %v871_v43, %v897_v8  ;;  %v903_v6 = vsub.f32 %v2126_v63, %v901_v57 }
  0xc6   :  { %904 = vst [vmem:[#allocation7] sm:$0xff] %v894_v16 }
  0xc7   :  { %905 = vst [vmem:[#allocation7 + $0x8] sm:$0xff] %v895_v44 }
  0xc8   :  { %907 = vst [vmem:[#allocation7 + $0x10] sm:$0xff] %v898_v22 }
  0xc9   :  { %908 = vst [vmem:[#allocation7 + $0x18] sm:$0xff] %v899_v26 }
  0xca   :  { %910 = vst [vmem:[#allocation7 + $0x20] sm:$0xff] %v902_v35 }
  0xcb   :  { %911 = vst [vmem:[#allocation7 + $0x28] sm:$0xff] %v903_v6 }
  0xcc   :  { %927 = dma.vmem_to_hbm [thread:$0]  %s920_s1, 1024, %s922_s23, [#allocation4], %s1035_s17, %s1035_s17, %s1036_s18  }
  0xcd   :  { %1032 = dma.done.wait [#allocation4], 1024  }
  0xce   :  { %1033 = vsyncadd [#allocation4], 4294966272 }
  0xcf   :  { %932 = vsyncpa [#allocation3], 1 }
  0xd0   :  { %933 = vsyncpa [#allocation6], 1 }
  0xd1   :  { %934 = vsyncpa [#allocation4], 1 }

</bundles_post_ra>
